<compile_context>
chip_gen: v5e
topology: v5e:2x2
jax: 0.10.0
libtpu: 0.0.40
codegen_flags: <defaults>
</compile_context>

<pallas_src>
import functools

import jax
import jax.numpy as jnp
from jax import lax
from jax.experimental import pallas as pl
from jax.experimental.pallas import tpu as pltpu
import numpy as np


def rnn_net_kernel(x_ref, wih_ref, whh_ref, b_ref, wfc_ref, bfc_ref,
                   out_ref, xp_ref, h_ref, *, matmul_dtype):
    """One grid step = one (batch-tile, time-chunk) of the recurrence.

    x_ref   : (T_CHUNK, TB, D) time-major input slab (x fed as (S, B, D)).
    wih_ref : (D, H)  W_ih^T    (matmul_dtype, single-buffered, resident)
    whh_ref : (H, H)  W_hh^T    (matmul_dtype, single-buffered, resident)
    b_ref   : (1, H)  b_ih+b_hh (f32)
    wfc_ref : (H, D)  W_fc^T    (matmul_dtype, single-buffered, resident)
    bfc_ref : (1, D)  b_fc      (f32)
    out_ref : (TB, D)           fc output block (resident across the time
                                axis; written on the last chunk only).
    xp_ref  : (T_CHUNK*TB, H) f32 VMEM scratch -- chunk input projection.
    h_ref   : (TB, H)         f32 VMEM scratch -- hidden-state carry.
    """
    t = pl.program_id(1)

    @pl.when(t == 0)
    def _():
        h_ref[...] = jnp.zeros_like(h_ref)

    T, TB, D = x_ref.shape          # static Python ints
    H = whh_ref.shape[1]

    # ---- Hoisted input projection for the whole chunk ----------------------
    # Written to VMEM scratch so only one (TB, H) slab is live per recurrence
    # step (bounds vreg pressure; keeps spills off the serial critical path).
    if TB % 8 == 0:
        # (T, TB, D) -> (T*TB, D) is a free sublane relabel when TB % 8 == 0:
        # one big (T*TB, D) x (D, H) MXU matmul, f32 accumulation.
        x2 = x_ref[...].reshape(T * TB, D).astype(matmul_dtype)
        xp_ref[...] = (
            jnp.dot(x2, wih_ref[...], preferred_element_type=jnp.float32)
            + b_ref[...])                                  # (1, H) broadcast
    else:
        # Tiny / odd batch tile: avoid any relayout; T independent (TB, D)
        # matmuls, still hoisted off the serial recurrence chain.
        for i in range(T):
            xp_ref[pl.ds(i * TB, TB), :] = (
                jnp.dot(x_ref[i].astype(matmul_dtype), wih_ref[...],
                        preferred_element_type=jnp.float32)
                + b_ref[...])

    # ---- Sequential recurrence over the chunk ------------------------------
    # T is static -> fully unrolled with static slab slices; only the small
    # (TB, H) x (H, H) recurrent matmul + tanh remain per step.  The hidden
    # carry stays f32; only the MXU operand is cast to matmul_dtype.
    # TODO(synk): on v5e with TB << 128, drive this with
    # pltpu.matmul_push_rhs/matmul_acc_lhs/matmul_pop to push W_hh^T once per
    # chunk instead of once per step.
    h = h_ref[...]
    for i in range(T):
        slab = xp_ref[pl.ds(i * TB, TB), :]               # static slice
        h = jnp.tanh(
            slab + jnp.dot(h.astype(matmul_dtype), whh_ref[...],
                           preferred_element_type=jnp.float32))
    h_ref[...] = h

    # ---- Final linear head (once per batch tile, on the last chunk) --------
    @pl.when(t == pl.num_programs(1) - 1)
    def _():
        out_ref[...] = (
            jnp.dot(h.astype(matmul_dtype), wfc_ref[...],
                    preferred_element_type=jnp.float32)
            + bfc_ref[...]
        ).astype(out_ref.dtype)


def _vmem_estimate(tb, t_chunk, D, H, x_bytes, w_bytes, out_bytes,
                   single_buffer_weights):
    """Rough per-kernel VMEM footprint in bytes."""
    n_wbuf = 1 if single_buffer_weights else 2
    x_blk = 2 * tb * t_chunk * D * x_bytes             # double-buffered x stream
    xp = tb * t_chunk * H * 4                           # f32 projection scratch
    h_carry = tb * H * 4                                # f32 hidden carry
    wts = n_wbuf * ((D * H + H * H + H * D) * w_bytes + (H + D) * 4)
    out_blk = 2 * tb * D * out_bytes
    return x_blk + xp + h_carry + wts + out_blk


def rnn_net_forward(x, w_ih, w_hh, b_ih, b_hh, w_fc, b_fc, *,
                    tb=None, t_chunk=None, matmul_dtype=jnp.float32,
                    vmem_budget_bytes=48 * 1024 * 1024,
                    single_buffer_weights=True):
    """x: (B, S, D) batch-first, like the PyTorch module. Returns (B, D).

    matmul_dtype=jnp.bfloat16 casts MXU operands (x, weights, h fed to the
    MXU) to bf16 with f32 accumulation -- recommended on v5e, v6e and v7x.
    The f32 hidden carry is re-quantized each step, so bf16 error compounds
    over long sequences.

    vmem_budget_bytes bounds the (tb, t_chunk) auto-tiling; the 48 MiB default
    is sized for v7x's 64 MiB VMEM -- raise it (e.g. 96 MiB) on v5e/v6e.
    """
    B, S, D = x.shape
    H = w_ih.shape[0]
    mm = jnp.dtype(matmul_dtype)
    x_bytes = mm.itemsize                 # x is cast to matmul_dtype in-wrapper
    w_bytes = mm.itemsize
    out_bytes = jnp.dtype(x.dtype).itemsize

    # ---- Batch tile: fill the MXU wave (128 rows v5e, 256 v6e/v7x) ---------
    if tb is None:
        if B <= 8 or B % 8 != 0:
            tb = B                                      # tiny / odd batch
        else:
            tb = 8
            for cand in (256, 128, 64, 32, 16, 8):
                if B % cand == 0:
                    tb = cand
                    break
            # v7x megacore: keep >= 2 batch tiles when each still fills a
            # 128-row MXU wave.
            if B // tb == 1 and B >= 256 and (B // 2) % 8 == 0:
                tb = B // 2
    assert B % tb == 0, "tb must divide B"

    # ---- Time chunk: as large as the VMEM budget permits -------------------
    def pick_chunk(tb_):
        cands = [S] + [c for c in (256, 128, 64, 32, 24, 16, 8)
                       if c < S and S % c == 0]
        for c in cands:
            if _vmem_estimate(tb_, c, D, H, x_bytes, w_bytes, out_bytes,
                              single_buffer_weights) <= vmem_budget_bytes:
                return c
        return None

    if t_chunk is None:
        t_chunk = pick_chunk(tb)
        while t_chunk is None and tb % 16 == 0:
            tb //= 2                      # shrink batch tile before giving up
            t_chunk = pick_chunk(tb)
        if t_chunk is None:
            # TODO(synk): pad S to a divisible length instead of falling back
            # to the smallest divisor when even that exceeds the VMEM budget.
            t_chunk = S
            for c in (8, 16, 24, 32):
                if S % c == 0:
                    t_chunk = c
                    break
    assert S % t_chunk == 0, "t_chunk must divide S"

    est = _vmem_estimate(tb, t_chunk, D, H, x_bytes, w_bytes, out_bytes,
                         single_buffer_weights)
    vmem_limit_bytes = int(max(32 << 20,
                               min(est + (8 << 20),
                                   vmem_budget_bytes + (16 << 20))))

    # ---- Parameters in kernel layout ---------------------------------------
    # x fed time-major (S, B, D): the transpose (and bf16 cast, if any) fuse
    # into one XLA op outside the kernel, removing the per-chunk in-kernel
    # relayout from the serial critical path.
    x_k = jnp.transpose(x, (1, 0, 2)).astype(mm)
    wih_t = jnp.transpose(w_ih).astype(mm)                  # (D, H)
    whh_t = jnp.transpose(w_hh).astype(mm)                  # (H, H)
    b_comb = (b_ih + b_hh).reshape(1, H).astype(jnp.float32)
    wfc_t = jnp.transpose(w_fc).astype(mm)                  # (H, D)
    bfc = b_fc.reshape(1, D).astype(jnp.float32)

    # Constant-index (weight/bias) inputs never change blocks: single-buffer
    # them to halve their VMEM footprint (critical for large H on v7x).
    def const_spec(shape):
        if single_buffer_weights:
            return pl.BlockSpec(shape, lambda b, t: (0, 0),
                                pipeline_mode=pl.Buffered(1))
        return pl.BlockSpec(shape, lambda b, t: (0, 0))

    kernel = functools.partial(rnn_net_kernel, matmul_dtype=mm)

    return pl.pallas_call(
        kernel,
        out_shape=jax.ShapeDtypeStruct((B, D), x.dtype),
        grid_spec=pltpu.PrefetchScalarGridSpec(
            num_scalar_prefetch=0,
            grid=(B // tb, S // t_chunk),
            in_specs=[
                # x in time-major (S, B, D) layout -> chunk arrives time-major.
                pl.BlockSpec((t_chunk, tb, D), lambda b, t: (t, b, 0)),
                const_spec((D, H)),                      # W_ih^T
                const_spec((H, H)),                      # W_hh^T
                const_spec((1, H)),                      # b_ih + b_hh
                const_spec((H, D)),                      # W_fc^T
                const_spec((1, D)),                      # b_fc
            ],
            out_specs=pl.BlockSpec((tb, D), lambda b, t: (b, 0)),
            scratch_shapes=[
                pltpu.VMEM((t_chunk * tb, H), jnp.float32),   # xp (chunk proj)
                pltpu.VMEM((tb, H), jnp.float32),             # hidden carry
            ],
        ),
        compiler_params=pltpu.CompilerParams(
            dimension_semantics=("parallel", "arbitrary"),
            vmem_limit_bytes=vmem_limit_bytes,
        ),
    )(x_k, wih_t, whh_t, b_comb, wfc_t, bfc)


def rnn_net_reference(x, w_ih, w_hh, b_ih, b_hh, w_fc, b_fc):
    """Plain-JAX f32 reference matching nn.RNN (tanh) + nn.Linear."""
    B, S, D = x.shape
    H = w_ih.shape[0]
    h0 = jnp.zeros((B, H), jnp.float32)

    def step(h, x_t):
        h_new = jnp.tanh(x_t @ w_ih.T + b_ih + h @ w_hh.T + b_hh)
        return h_new, None

    h_final, _ = lax.scan(step, h0, jnp.transpose(x, (1, 0, 2)))
    return h_final @ w_fc.T + b_fc


if __name__ == "__main__":
    # Small shapes consistent with the module's forward:
    # batch=2, seq=16, input_size=16, hidden_size=32.
    B, S, D, H = 2, 16, 16, 32

    key = jax.random.PRNGKey(0)
    ks = jax.random.split(key, 7)
    bound = 1.0 / float(np.sqrt(H))     # PyTorch-style uniform init bound

    x = jax.random.normal(ks[0], (B, S, D), jnp.float32)
    w_ih = jax.random.uniform(ks[1], (H, D), jnp.float32, -bound, bound)
    w_hh = jax.random.uniform(ks[2], (H, H), jnp.float32, -bound, bound)
    b_ih = jax.random.uniform(ks[3], (H,), jnp.float32, -bound, bound)
    b_hh = jax.random.uniform(ks[4], (H,), jnp.float32, -bound, bound)
    w_fc = jax.random.uniform(ks[5], (D, H), jnp.float32, -bound, bound)
    b_fc = jax.random.uniform(ks[6], (D,), jnp.float32, -bound, bound)

    args = (x, w_ih, w_hh, b_ih, b_hh, w_fc, b_fc)
    ref = rnn_net_reference(*args)

    def run(**kw):
        fwd = jax.jit(functools.partial(rnn_net_forward, **kw))
        return jax.block_until_ready(fwd(*args))

    # f32 path (exact semantics): two time-chunks -> exercises the cross-chunk
    # hidden-state carry in VMEM scratch.  If single-buffered constant inputs
    # are not supported on this JAX/libtpu build, fall back to default
    # double-buffering (correctness is identical).
    single_buffer = True
    try:
        out_f32 = run(t_chunk=8, single_buffer_weights=True)
        np.testing.assert_allclose(np.asarray(out_f32), np.asarray(ref),
                                   rtol=1e-5, atol=1e-5)
    except Exception:
        single_buffer = False
        out_f32 = run(t_chunk=8, single_buffer_weights=False)
        np.testing.assert_allclose(np.asarray(out_f32), np.asarray(ref),
                                   rtol=1e-5, atol=1e-5)

    # bf16 MXU-operand path (recommended on v5e/v6e/v7x): loose tolerance vs
    # the pure-f32 reference; exact semantics already verified above.
    out_bf16 = run(matmul_dtype=jnp.bfloat16,
                   single_buffer_weights=single_buffer)
    np.testing.assert_allclose(np.asarray(out_bf16), np.asarray(ref),
                               rtol=1e-1, atol=1e-1)

    print("KERNEL_OK")
</pallas_src>

<mosaic_0001>
module attributes {stable_mosaic.version = 11 : i64} {
  func.func @rnn_net_kernel(%arg0: i32, %arg1: i32, %arg2: memref<8x2x16xf32, #tpu.memory_space<vmem>>, %arg3: memref<16x32xf32, #tpu.memory_space<vmem>>, %arg4: memref<32x32xf32, #tpu.memory_space<vmem>>, %arg5: memref<1x32xf32, #tpu.memory_space<vmem>>, %arg6: memref<32x16xf32, #tpu.memory_space<vmem>>, %arg7: memref<1x16xf32, #tpu.memory_space<vmem>>, %arg8: memref<2x16xf32, #tpu.memory_space<vmem>>, %arg9: memref<16x32xf32, #tpu.memory_space<vmem>>, %arg10: memref<2x32xf32, #tpu.memory_space<vmem>>) attributes {dimension_semantics = [#tpu.dimension_semantics<parallel>, #tpu.dimension_semantics<arbitrary>], iteration_bounds = array<i64: 1, 2>, scalar_prefetch = 0 : i64, scratch_operands = 2 : i64, tpu.core_type = #tpu.core_type<tc>, window_params = [{transform_indices = @transform_0, window_bounds = array<i64: 8, 2, 16>}, {pipeline_mode = #tpu.pipeline_mode<synchronous>, transform_indices = @transform_1, window_bounds = array<i64: 16, 32>}, {pipeline_mode = #tpu.pipeline_mode<synchronous>, transform_indices = @transform_2, window_bounds = array<i64: 32, 32>}, {pipeline_mode = #tpu.pipeline_mode<synchronous>, transform_indices = @transform_3, window_bounds = array<i64: 1, 32>}, {pipeline_mode = #tpu.pipeline_mode<synchronous>, transform_indices = @transform_4, window_bounds = array<i64: 32, 16>}, {pipeline_mode = #tpu.pipeline_mode<synchronous>, transform_indices = @transform_5, window_bounds = array<i64: 1, 16>}, {transform_indices = @transform_6, window_bounds = array<i64: 2, 16>}]} {
    %c0_i32 = arith.constant 0 : i32
    %0 = arith.cmpi eq, %arg1, %c0_i32 : i32
    %1 = arith.extui %0 : i1 to i32
    %c0_i32_0 = arith.constant 0 : i32
    %2 = arith.cmpi ne, %1, %c0_i32_0 : i32
    scf.if %2 {
      %cst_113 = arith.constant 0.000000e+00 : f32
      %112 = vector.broadcast %cst_113 : f32 to vector<2x32xf32>
      %c0_114 = arith.constant 0 : index
      %c0_115 = arith.constant 0 : index
      %113 = vector.load %arg10[%c0_114, %c0_115] : memref<2x32xf32, #tpu.memory_space<vmem>>, vector<2x32xf32>
      tpu.vector_store %arg10[%c0_114, %c0_115], %112 {strides = array<i32>} : memref<2x32xf32, #tpu.memory_space<vmem>>, vector<2x32xf32>,
    } else {
    }
    %c0 = arith.constant 0 : index
    %c0_1 = arith.constant 0 : index
    %c0_2 = arith.constant 0 : index
    %3 = vector.load %arg2[%c0, %c0_1, %c0_2] : memref<8x2x16xf32, #tpu.memory_space<vmem>>, vector<1x2x16xf32>
    %4 = vector.shape_cast %3 : vector<1x2x16xf32> to vector<2x16xf32>
    %c0_3 = arith.constant 0 : index
    %c0_4 = arith.constant 0 : index
    %5 = vector.load %arg3[%c0_3, %c0_4] : memref<16x32xf32, #tpu.memory_space<vmem>>, vector<16x32xf32>
    %cst = arith.constant dense<0.000000e+00> : vector<2x32xf32>
    %6 = tpu.matmul %4, %5, %cst {dimension_numbers = #tpu.dot_dimension_numbers<[1], [0], [0], [1], [0, 0, 1, 1], [], []>} : vector<2x16xf32>, vector<16x32xf32>, vector<2x32xf32> -> vector<2x32xf32>
    %c0_5 = arith.constant 0 : index
    %c0_6 = arith.constant 0 : index
    %7 = vector.load %arg5[%c0_5, %c0_6] : memref<1x32xf32, #tpu.memory_space<vmem>>, vector<1x32xf32>
    %8 = vector.broadcast %7 : vector<1x32xf32> to vector<2x32xf32>
    %9 = arith.addf %6, %8 : vector<2x32xf32>
    %c0_7 = arith.constant 0 : index
    %c0_8 = arith.constant 0 : index
    %10 = vector.load %arg9[%c0_7, %c0_8] : memref<16x32xf32, #tpu.memory_space<vmem>>, vector<2x32xf32>
    tpu.vector_store %arg9[%c0_7, %c0_8], %9 {strides = array<i32>} : memref<16x32xf32, #tpu.memory_space<vmem>>, vector<2x32xf32>,
    %c1 = arith.constant 1 : index
    %c0_9 = arith.constant 0 : index
    %c0_10 = arith.constant 0 : index
    %11 = vector.load %arg2[%c1, %c0_9, %c0_10] : memref<8x2x16xf32, #tpu.memory_space<vmem>>, vector<1x2x16xf32>
    %12 = vector.shape_cast %11 : vector<1x2x16xf32> to vector<2x16xf32>
    %c0_11 = arith.constant 0 : index
    %c0_12 = arith.constant 0 : index
    %13 = vector.load %arg3[%c0_11, %c0_12] : memref<16x32xf32, #tpu.memory_space<vmem>>, vector<16x32xf32>
    %cst_13 = arith.constant dense<0.000000e+00> : vector<2x32xf32>
    %14 = tpu.matmul %12, %13, %cst_13 {dimension_numbers = #tpu.dot_dimension_numbers<[1], [0], [0], [1], [0, 0, 1, 1], [], []>} : vector<2x16xf32>, vector<16x32xf32>, vector<2x32xf32> -> vector<2x32xf32>
    %c0_14 = arith.constant 0 : index
    %c0_15 = arith.constant 0 : index
    %15 = vector.load %arg5[%c0_14, %c0_15] : memref<1x32xf32, #tpu.memory_space<vmem>>, vector<1x32xf32>
    %16 = vector.broadcast %15 : vector<1x32xf32> to vector<2x32xf32>
    %17 = arith.addf %14, %16 : vector<2x32xf32>
    %c2 = arith.constant 2 : index
    %c0_16 = arith.constant 0 : index
    %18 = vector.load %arg9[%c2, %c0_16] : memref<16x32xf32, #tpu.memory_space<vmem>>, vector<2x32xf32>
    tpu.vector_store %arg9[%c2, %c0_16], %17 {strides = array<i32>} : memref<16x32xf32, #tpu.memory_space<vmem>>, vector<2x32xf32>,
    %c2_17 = arith.constant 2 : index
    %c0_18 = arith.constant 0 : index
    %c0_19 = arith.constant 0 : index
    %19 = vector.load %arg2[%c2_17, %c0_18, %c0_19] : memref<8x2x16xf32, #tpu.memory_space<vmem>>, vector<1x2x16xf32>
    %20 = vector.shape_cast %19 : vector<1x2x16xf32> to vector<2x16xf32>
    %c0_20 = arith.constant 0 : index
    %c0_21 = arith.constant 0 : index
    %21 = vector.load %arg3[%c0_20, %c0_21] : memref<16x32xf32, #tpu.memory_space<vmem>>, vector<16x32xf32>
    %cst_22 = arith.constant dense<0.000000e+00> : vector<2x32xf32>
    %22 = tpu.matmul %20, %21, %cst_22 {dimension_numbers = #tpu.dot_dimension_numbers<[1], [0], [0], [1], [0, 0, 1, 1], [], []>} : vector<2x16xf32>, vector<16x32xf32>, vector<2x32xf32> -> vector<2x32xf32>
    %c0_23 = arith.constant 0 : index
    %c0_24 = arith.constant 0 : index
    %23 = vector.load %arg5[%c0_23, %c0_24] : memref<1x32xf32, #tpu.memory_space<vmem>>, vector<1x32xf32>
    %24 = vector.broadcast %23 : vector<1x32xf32> to vector<2x32xf32>
    %25 = arith.addf %22, %24 : vector<2x32xf32>
    %c4 = arith.constant 4 : index
    %c0_25 = arith.constant 0 : index
    %26 = vector.load %arg9[%c4, %c0_25] : memref<16x32xf32, #tpu.memory_space<vmem>>, vector<2x32xf32>
    tpu.vector_store %arg9[%c4, %c0_25], %25 {strides = array<i32>} : memref<16x32xf32, #tpu.memory_space<vmem>>, vector<2x32xf32>,
    %c3 = arith.constant 3 : index
    %c0_26 = arith.constant 0 : index
    %c0_27 = arith.constant 0 : index
    %27 = vector.load %arg2[%c3, %c0_26, %c0_27] : memref<8x2x16xf32, #tpu.memory_space<vmem>>, vector<1x2x16xf32>
    %28 = vector.shape_cast %27 : vector<1x2x16xf32> to vector<2x16xf32>
    %c0_28 = arith.constant 0 : index
    %c0_29 = arith.constant 0 : index
    %29 = vector.load %arg3[%c0_28, %c0_29] : memref<16x32xf32, #tpu.memory_space<vmem>>, vector<16x32xf32>
    %cst_30 = arith.constant dense<0.000000e+00> : vector<2x32xf32>
    %30 = tpu.matmul %28, %29, %cst_30 {dimension_numbers = #tpu.dot_dimension_numbers<[1], [0], [0], [1], [0, 0, 1, 1], [], []>} : vector<2x16xf32>, vector<16x32xf32>, vector<2x32xf32> -> vector<2x32xf32>
    %c0_31 = arith.constant 0 : index
    %c0_32 = arith.constant 0 : index
    %31 = vector.load %arg5[%c0_31, %c0_32] : memref<1x32xf32, #tpu.memory_space<vmem>>, vector<1x32xf32>
    %32 = vector.broadcast %31 : vector<1x32xf32> to vector<2x32xf32>
    %33 = arith.addf %30, %32 : vector<2x32xf32>
    %c6 = arith.constant 6 : index
    %c0_33 = arith.constant 0 : index
    %34 = vector.load %arg9[%c6, %c0_33] : memref<16x32xf32, #tpu.memory_space<vmem>>, vector<2x32xf32>
    tpu.vector_store %arg9[%c6, %c0_33], %33 {strides = array<i32>} : memref<16x32xf32, #tpu.memory_space<vmem>>, vector<2x32xf32>,
    %c4_34 = arith.constant 4 : index
    %c0_35 = arith.constant 0 : index
    %c0_36 = arith.constant 0 : index
    %35 = vector.load %arg2[%c4_34, %c0_35, %c0_36] : memref<8x2x16xf32, #tpu.memory_space<vmem>>, vector<1x2x16xf32>
    %36 = vector.shape_cast %35 : vector<1x2x16xf32> to vector<2x16xf32>
    %c0_37 = arith.constant 0 : index
    %c0_38 = arith.constant 0 : index
    %37 = vector.load %arg3[%c0_37, %c0_38] : memref<16x32xf32, #tpu.memory_space<vmem>>, vector<16x32xf32>
    %cst_39 = arith.constant dense<0.000000e+00> : vector<2x32xf32>
    %38 = tpu.matmul %36, %37, %cst_39 {dimension_numbers = #tpu.dot_dimension_numbers<[1], [0], [0], [1], [0, 0, 1, 1], [], []>} : vector<2x16xf32>, vector<16x32xf32>, vector<2x32xf32> -> vector<2x32xf32>
    %c0_40 = arith.constant 0 : index
    %c0_41 = arith.constant 0 : index
    %39 = vector.load %arg5[%c0_40, %c0_41] : memref<1x32xf32, #tpu.memory_space<vmem>>, vector<1x32xf32>
    %40 = vector.broadcast %39 : vector<1x32xf32> to vector<2x32xf32>
    %41 = arith.addf %38, %40 : vector<2x32xf32>
    %c8 = arith.constant 8 : index
    %c0_42 = arith.constant 0 : index
    %42 = vector.load %arg9[%c8, %c0_42] : memref<16x32xf32, #tpu.memory_space<vmem>>, vector<2x32xf32>
    tpu.vector_store %arg9[%c8, %c0_42], %41 {strides = array<i32>} : memref<16x32xf32, #tpu.memory_space<vmem>>, vector<2x32xf32>,
    %c5 = arith.constant 5 : index
    %c0_43 = arith.constant 0 : index
    %c0_44 = arith.constant 0 : index
    %43 = vector.load %arg2[%c5, %c0_43, %c0_44] : memref<8x2x16xf32, #tpu.memory_space<vmem>>, vector<1x2x16xf32>
    %44 = vector.shape_cast %43 : vector<1x2x16xf32> to vector<2x16xf32>
    %c0_45 = arith.constant 0 : index
    %c0_46 = arith.constant 0 : index
    %45 = vector.load %arg3[%c0_45, %c0_46] : memref<16x32xf32, #tpu.memory_space<vmem>>, vector<16x32xf32>
    %cst_47 = arith.constant dense<0.000000e+00> : vector<2x32xf32>
    %46 = tpu.matmul %44, %45, %cst_47 {dimension_numbers = #tpu.dot_dimension_numbers<[1], [0], [0], [1], [0, 0, 1, 1], [], []>} : vector<2x16xf32>, vector<16x32xf32>, vector<2x32xf32> -> vector<2x32xf32>
    %c0_48 = arith.constant 0 : index
    %c0_49 = arith.constant 0 : index
    %47 = vector.load %arg5[%c0_48, %c0_49] : memref<1x32xf32, #tpu.memory_space<vmem>>, vector<1x32xf32>
    %48 = vector.broadcast %47 : vector<1x32xf32> to vector<2x32xf32>
    %49 = arith.addf %46, %48 : vector<2x32xf32>
    %c10 = arith.constant 10 : index
    %c0_50 = arith.constant 0 : index
    %50 = vector.load %arg9[%c10, %c0_50] : memref<16x32xf32, #tpu.memory_space<vmem>>, vector<2x32xf32>
    tpu.vector_store %arg9[%c10, %c0_50], %49 {strides = array<i32>} : memref<16x32xf32, #tpu.memory_space<vmem>>, vector<2x32xf32>,
    %c6_51 = arith.constant 6 : index
    %c0_52 = arith.constant 0 : index
    %c0_53 = arith.constant 0 : index
    %51 = vector.load %arg2[%c6_51, %c0_52, %c0_53] : memref<8x2x16xf32, #tpu.memory_space<vmem>>, vector<1x2x16xf32>
    %52 = vector.shape_cast %51 : vector<1x2x16xf32> to vector<2x16xf32>
    %c0_54 = arith.constant 0 : index
    %c0_55 = arith.constant 0 : index
    %53 = vector.load %arg3[%c0_54, %c0_55] : memref<16x32xf32, #tpu.memory_space<vmem>>, vector<16x32xf32>
    %cst_56 = arith.constant dense<0.000000e+00> : vector<2x32xf32>
    %54 = tpu.matmul %52, %53, %cst_56 {dimension_numbers = #tpu.dot_dimension_numbers<[1], [0], [0], [1], [0, 0, 1, 1], [], []>} : vector<2x16xf32>, vector<16x32xf32>, vector<2x32xf32> -> vector<2x32xf32>
    %c0_57 = arith.constant 0 : index
    %c0_58 = arith.constant 0 : index
    %55 = vector.load %arg5[%c0_57, %c0_58] : memref<1x32xf32, #tpu.memory_space<vmem>>, vector<1x32xf32>
    %56 = vector.broadcast %55 : vector<1x32xf32> to vector<2x32xf32>
    %57 = arith.addf %54, %56 : vector<2x32xf32>
    %c12 = arith.constant 12 : index
    %c0_59 = arith.constant 0 : index
    %58 = vector.load %arg9[%c12, %c0_59] : memref<16x32xf32, #tpu.memory_space<vmem>>, vector<2x32xf32>
    tpu.vector_store %arg9[%c12, %c0_59], %57 {strides = array<i32>} : memref<16x32xf32, #tpu.memory_space<vmem>>, vector<2x32xf32>,
    %c7 = arith.constant 7 : index
    %c0_60 = arith.constant 0 : index
    %c0_61 = arith.constant 0 : index
    %59 = vector.load %arg2[%c7, %c0_60, %c0_61] : memref<8x2x16xf32, #tpu.memory_space<vmem>>, vector<1x2x16xf32>
    %60 = vector.shape_cast %59 : vector<1x2x16xf32> to vector<2x16xf32>
    %c0_62 = arith.constant 0 : index
    %c0_63 = arith.constant 0 : index
    %61 = vector.load %arg3[%c0_62, %c0_63] : memref<16x32xf32, #tpu.memory_space<vmem>>, vector<16x32xf32>
    %cst_64 = arith.constant dense<0.000000e+00> : vector<2x32xf32>
    %62 = tpu.matmul %60, %61, %cst_64 {dimension_numbers = #tpu.dot_dimension_numbers<[1], [0], [0], [1], [0, 0, 1, 1], [], []>} : vector<2x16xf32>, vector<16x32xf32>, vector<2x32xf32> -> vector<2x32xf32>
    %c0_65 = arith.constant 0 : index
    %c0_66 = arith.constant 0 : index
    %63 = vector.load %arg5[%c0_65, %c0_66] : memref<1x32xf32, #tpu.memory_space<vmem>>, vector<1x32xf32>
    %64 = vector.broadcast %63 : vector<1x32xf32> to vector<2x32xf32>
    %65 = arith.addf %62, %64 : vector<2x32xf32>
    %c14 = arith.constant 14 : index
    %c0_67 = arith.constant 0 : index
    %66 = vector.load %arg9[%c14, %c0_67] : memref<16x32xf32, #tpu.memory_space<vmem>>, vector<2x32xf32>
    tpu.vector_store %arg9[%c14, %c0_67], %65 {strides = array<i32>} : memref<16x32xf32, #tpu.memory_space<vmem>>, vector<2x32xf32>,
    %c0_68 = arith.constant 0 : index
    %c0_69 = arith.constant 0 : index
    %67 = vector.load %arg10[%c0_68, %c0_69] : memref<2x32xf32, #tpu.memory_space<vmem>>, vector<2x32xf32>
    %c0_70 = arith.constant 0 : index
    %c0_71 = arith.constant 0 : index
    %68 = vector.load %arg9[%c0_70, %c0_71] : memref<16x32xf32, #tpu.memory_space<vmem>>, vector<2x32xf32>
    %c0_72 = arith.constant 0 : index
    %c0_73 = arith.constant 0 : index
    %69 = vector.load %arg4[%c0_72, %c0_73] : memref<32x32xf32, #tpu.memory_space<vmem>>, vector<32x32xf32>
    %cst_74 = arith.constant dense<0.000000e+00> : vector<2x32xf32>
    %70 = tpu.matmul %67, %69, %cst_74 {dimension_numbers = #tpu.dot_dimension_numbers<[1], [0], [0], [1], [0, 0, 1, 1], [], []>} : vector<2x32xf32>, vector<32x32xf32>, vector<2x32xf32> -> vector<2x32xf32>
    %71 = arith.addf %68, %70 : vector<2x32xf32>
    %72 = math.tanh %71 : vector<2x32xf32>
    %c2_75 = arith.constant 2 : index
    %c0_76 = arith.constant 0 : index
    %73 = vector.load %arg9[%c2_75, %c0_76] : memref<16x32xf32, #tpu.memory_space<vmem>>, vector<2x32xf32>
    %c0_77 = arith.constant 0 : index
    %c0_78 = arith.constant 0 : index
    %74 = vector.load %arg4[%c0_77, %c0_78] : memref<32x32xf32, #tpu.memory_space<vmem>>, vector<32x32xf32>
    %cst_79 = arith.constant dense<0.000000e+00> : vector<2x32xf32>
    %75 = tpu.matmul %72, %74, %cst_79 {dimension_numbers = #tpu.dot_dimension_numbers<[1], [0], [0], [1], [0, 0, 1, 1], [], []>} : vector<2x32xf32>, vector<32x32xf32>, vector<2x32xf32> -> vector<2x32xf32>
    %76 = arith.addf %73, %75 : vector<2x32xf32>
    %77 = math.tanh %76 : vector<2x32xf32>
    %c4_80 = arith.constant 4 : index
    %c0_81 = arith.constant 0 : index
    %78 = vector.load %arg9[%c4_80, %c0_81] : memref<16x32xf32, #tpu.memory_space<vmem>>, vector<2x32xf32>
    %c0_82 = arith.constant 0 : index
    %c0_83 = arith.constant 0 : index
    %79 = vector.load %arg4[%c0_82, %c0_83] : memref<32x32xf32, #tpu.memory_space<vmem>>, vector<32x32xf32>
    %cst_84 = arith.constant dense<0.000000e+00> : vector<2x32xf32>
    %80 = tpu.matmul %77, %79, %cst_84 {dimension_numbers = #tpu.dot_dimension_numbers<[1], [0], [0], [1], [0, 0, 1, 1], [], []>} : vector<2x32xf32>, vector<32x32xf32>, vector<2x32xf32> -> vector<2x32xf32>
    %81 = arith.addf %78, %80 : vector<2x32xf32>
    %82 = math.tanh %81 : vector<2x32xf32>
    %c6_85 = arith.constant 6 : index
    %c0_86 = arith.constant 0 : index
    %83 = vector.load %arg9[%c6_85, %c0_86] : memref<16x32xf32, #tpu.memory_space<vmem>>, vector<2x32xf32>
    %c0_87 = arith.constant 0 : index
    %c0_88 = arith.constant 0 : index
    %84 = vector.load %arg4[%c0_87, %c0_88] : memref<32x32xf32, #tpu.memory_space<vmem>>, vector<32x32xf32>
    %cst_89 = arith.constant dense<0.000000e+00> : vector<2x32xf32>
    %85 = tpu.matmul %82, %84, %cst_89 {dimension_numbers = #tpu.dot_dimension_numbers<[1], [0], [0], [1], [0, 0, 1, 1], [], []>} : vector<2x32xf32>, vector<32x32xf32>, vector<2x32xf32> -> vector<2x32xf32>
    %86 = arith.addf %83, %85 : vector<2x32xf32>
    %87 = math.tanh %86 : vector<2x32xf32>
    %c8_90 = arith.constant 8 : index
    %c0_91 = arith.constant 0 : index
    %88 = vector.load %arg9[%c8_90, %c0_91] : memref<16x32xf32, #tpu.memory_space<vmem>>, vector<2x32xf32>
    %c0_92 = arith.constant 0 : index
    %c0_93 = arith.constant 0 : index
    %89 = vector.load %arg4[%c0_92, %c0_93] : memref<32x32xf32, #tpu.memory_space<vmem>>, vector<32x32xf32>
    %cst_94 = arith.constant dense<0.000000e+00> : vector<2x32xf32>
    %90 = tpu.matmul %87, %89, %cst_94 {dimension_numbers = #tpu.dot_dimension_numbers<[1], [0], [0], [1], [0, 0, 1, 1], [], []>} : vector<2x32xf32>, vector<32x32xf32>, vector<2x32xf32> -> vector<2x32xf32>
    %91 = arith.addf %88, %90 : vector<2x32xf32>
    %92 = math.tanh %91 : vector<2x32xf32>
    %c10_95 = arith.constant 10 : index
    %c0_96 = arith.constant 0 : index
    %93 = vector.load %arg9[%c10_95, %c0_96] : memref<16x32xf32, #tpu.memory_space<vmem>>, vector<2x32xf32>
    %c0_97 = arith.constant 0 : index
    %c0_98 = arith.constant 0 : index
    %94 = vector.load %arg4[%c0_97, %c0_98] : memref<32x32xf32, #tpu.memory_space<vmem>>, vector<32x32xf32>
    %cst_99 = arith.constant dense<0.000000e+00> : vector<2x32xf32>
    %95 = tpu.matmul %92, %94, %cst_99 {dimension_numbers = #tpu.dot_dimension_numbers<[1], [0], [0], [1], [0, 0, 1, 1], [], []>} : vector<2x32xf32>, vector<32x32xf32>, vector<2x32xf32> -> vector<2x32xf32>
    %96 = arith.addf %93, %95 : vector<2x32xf32>
    %97 = math.tanh %96 : vector<2x32xf32>
    %c12_100 = arith.constant 12 : index
    %c0_101 = arith.constant 0 : index
    %98 = vector.load %arg9[%c12_100, %c0_101] : memref<16x32xf32, #tpu.memory_space<vmem>>, vector<2x32xf32>
    %c0_102 = arith.constant 0 : index
    %c0_103 = arith.constant 0 : index
    %99 = vector.load %arg4[%c0_102, %c0_103] : memref<32x32xf32, #tpu.memory_space<vmem>>, vector<32x32xf32>
    %cst_104 = arith.constant dense<0.000000e+00> : vector<2x32xf32>
    %100 = tpu.matmul %97, %99, %cst_104 {dimension_numbers = #tpu.dot_dimension_numbers<[1], [0], [0], [1], [0, 0, 1, 1], [], []>} : vector<2x32xf32>, vector<32x32xf32>, vector<2x32xf32> -> vector<2x32xf32>
    %101 = arith.addf %98, %100 : vector<2x32xf32>
    %102 = math.tanh %101 : vector<2x32xf32>
    %c14_105 = arith.constant 14 : index
    %c0_106 = arith.constant 0 : index
    %103 = vector.load %arg9[%c14_105, %c0_106] : memref<16x32xf32, #tpu.memory_space<vmem>>, vector<2x32xf32>
    %c0_107 = arith.constant 0 : index
    %c0_108 = arith.constant 0 : index
    %104 = vector.load %arg4[%c0_107, %c0_108] : memref<32x32xf32, #tpu.memory_space<vmem>>, vector<32x32xf32>
    %cst_109 = arith.constant dense<0.000000e+00> : vector<2x32xf32>
    %105 = tpu.matmul %102, %104, %cst_109 {dimension_numbers = #tpu.dot_dimension_numbers<[1], [0], [0], [1], [0, 0, 1, 1], [], []>} : vector<2x32xf32>, vector<32x32xf32>, vector<2x32xf32> -> vector<2x32xf32>
    %106 = arith.addf %103, %105 : vector<2x32xf32>
    %107 = math.tanh %106 : vector<2x32xf32>
    %c0_110 = arith.constant 0 : index
    %c0_111 = arith.constant 0 : index
    %108 = vector.load %arg10[%c0_110, %c0_111] : memref<2x32xf32, #tpu.memory_space<vmem>>, vector<2x32xf32>
    tpu.vector_store %arg10[%c0_110, %c0_111], %107 {strides = array<i32>} : memref<2x32xf32, #tpu.memory_space<vmem>>, vector<2x32xf32>,
    %c1_i32 = arith.constant 1 : i32
    %109 = arith.cmpi eq, %arg1, %c1_i32 : i32
    %110 = arith.extui %109 : i1 to i32
    %c0_i32_112 = arith.constant 0 : i32
    %111 = arith.cmpi ne, %110, %c0_i32_112 : i32
    scf.if %111 {
      %c0_113 = arith.constant 0 : index
      %c0_114 = arith.constant 0 : index
      %112 = vector.load %arg6[%c0_113, %c0_114] : memref<32x16xf32, #tpu.memory_space<vmem>>, vector<32x16xf32>
      %cst_115 = arith.constant dense<0.000000e+00> : vector<2x16xf32>
      %113 = tpu.matmul %107, %112, %cst_115 {dimension_numbers = #tpu.dot_dimension_numbers<[1], [0], [0], [1], [0, 0, 1, 1], [], []>} : vector<2x32xf32>, vector<32x16xf32>, vector<2x16xf32> -> vector<2x16xf32>
      %c0_116 = arith.constant 0 : index
      %c0_117 = arith.constant 0 : index
      %114 = vector.load %arg7[%c0_116, %c0_117] : memref<1x16xf32, #tpu.memory_space<vmem>>, vector<1x16xf32>
      %115 = vector.broadcast %114 : vector<1x16xf32> to vector<2x16xf32>
      %116 = arith.addf %113, %115 : vector<2x16xf32>
      %c0_118 = arith.constant 0 : index
      %c0_119 = arith.constant 0 : index
      %117 = vector.load %arg8[%c0_118, %c0_119] : memref<2x16xf32, #tpu.memory_space<vmem>>, vector<2x16xf32>
      tpu.vector_store %arg8[%c0_118, %c0_119], %116 {strides = array<i32>} : memref<2x16xf32, #tpu.memory_space<vmem>>, vector<2x16xf32>,
    } else {
    }
    return
  }
  func.func @transform_0(%arg0: i32, %arg1: i32) -> (i32, i32, i32) {
    %c0_i32 = arith.constant 0 : i32
    %c0_i32_0 = arith.constant 0 : i32
    return %arg1, %arg0, %c0_i32 : i32, i32, i32
  }
  func.func @transform_1(%arg0: i32, %arg1: i32) -> (i32, i32) {
    %c0_i32 = arith.constant 0 : i32
    %c0_i32_0 = arith.constant 0 : i32
    %c0_i32_1 = arith.constant 0 : i32
    return %c0_i32, %c0_i32_0 : i32, i32
  }
  func.func @transform_2(%arg0: i32, %arg1: i32) -> (i32, i32) {
    %c0_i32 = arith.constant 0 : i32
    %c0_i32_0 = arith.constant 0 : i32
    %c0_i32_1 = arith.constant 0 : i32
    return %c0_i32, %c0_i32_0 : i32, i32
  }
  func.func @transform_3(%arg0: i32, %arg1: i32) -> (i32, i32) {
    %c0_i32 = arith.constant 0 : i32
    %c0_i32_0 = arith.constant 0 : i32
    %c0_i32_1 = arith.constant 0 : i32
    return %c0_i32, %c0_i32_0 : i32, i32
  }
  func.func @transform_4(%arg0: i32, %arg1: i32) -> (i32, i32) {
    %c0_i32 = arith.constant 0 : i32
    %c0_i32_0 = arith.constant 0 : i32
    %c0_i32_1 = arith.constant 0 : i32
    return %c0_i32, %c0_i32_0 : i32, i32
  }
  func.func @transform_5(%arg0: i32, %arg1: i32) -> (i32, i32) {
    %c0_i32 = arith.constant 0 : i32
    %c0_i32_0 = arith.constant 0 : i32
    %c0_i32_1 = arith.constant 0 : i32
    return %c0_i32, %c0_i32_0 : i32, i32
  }
  func.func @transform_6(%arg0: i32, %arg1: i32) -> (i32, i32) {
    %c0_i32 = arith.constant 0 : i32
    %c0_i32_0 = arith.constant 0 : i32
    return %arg0, %c0_i32 : i32, i32
  }
}

module attributes {stable_mosaic.version = 11 : i64} {
  func.func @rnn_net_kernel(%arg0: i32, %arg1: i32, %arg2: memref<8x2x16xf32, #tpu.memory_space<vmem>>, %arg3: memref<16x32xf32, #tpu.memory_space<vmem>>, %arg4: memref<32x32xf32, #tpu.memory_space<vmem>>, %arg5: memref<1x32xf32, #tpu.memory_space<vmem>>, %arg6: memref<32x16xf32, #tpu.memory_space<vmem>>, %arg7: memref<1x16xf32, #tpu.memory_space<vmem>>, %arg8: memref<2x16xf32, #tpu.memory_space<vmem>>, %arg9: memref<16x32xf32, #tpu.memory_space<vmem>>, %arg10: memref<2x32xf32, #tpu.memory_space<vmem>>) attributes {dimension_semantics = [#tpu.dimension_semantics<parallel>, #tpu.dimension_semantics<arbitrary>], iteration_bounds = array<i64: 1, 2>, scalar_prefetch = 0 : i64, scratch_operands = 2 : i64, tpu.core_type = #tpu.core_type<tc>, window_params = [{transform_indices = @transform_0, window_bounds = array<i64: 8, 2, 16>}, {pipeline_mode = #tpu.pipeline_mode<synchronous>, transform_indices = @transform_1, window_bounds = array<i64: 16, 32>}, {pipeline_mode = #tpu.pipeline_mode<synchronous>, transform_indices = @transform_2, window_bounds = array<i64: 32, 32>}, {pipeline_mode = #tpu.pipeline_mode<synchronous>, transform_indices = @transform_3, window_bounds = array<i64: 1, 32>}, {pipeline_mode = #tpu.pipeline_mode<synchronous>, transform_indices = @transform_4, window_bounds = array<i64: 32, 16>}, {pipeline_mode = #tpu.pipeline_mode<synchronous>, transform_indices = @transform_5, window_bounds = array<i64: 1, 16>}, {transform_indices = @transform_6, window_bounds = array<i64: 2, 16>}]} {
    %c0_i32 = arith.constant 0 : i32
    %0 = arith.cmpi eq, %arg1, %c0_i32 : i32
    %1 = arith.extui %0 : i1 to i32
    %c0_i32_0 = arith.constant 0 : i32
    %2 = arith.cmpi ne, %1, %c0_i32_0 : i32
    scf.if %2 {
      %cst_113 = arith.constant 0.000000e+00 : f32
      %112 = vector.broadcast %cst_113 : f32 to vector<2x32xf32>
      %c0_114 = arith.constant 0 : index
      %c0_115 = arith.constant 0 : index
      %113 = vector.load %arg10[%c0_114, %c0_115] : memref<2x32xf32, #tpu.memory_space<vmem>>, vector<2x32xf32>
      tpu.vector_store %arg10[%c0_114, %c0_115], %112 {strides = array<i32>} : memref<2x32xf32, #tpu.memory_space<vmem>>, vector<2x32xf32>,
    } else {
    }
    %c0 = arith.constant 0 : index
    %c0_1 = arith.constant 0 : index
    %c0_2 = arith.constant 0 : index
    %3 = vector.load %arg2[%c0, %c0_1, %c0_2] : memref<8x2x16xf32, #tpu.memory_space<vmem>>, vector<1x2x16xf32>
    %4 = vector.shape_cast %3 : vector<1x2x16xf32> to vector<2x16xf32>
    %c0_3 = arith.constant 0 : index
    %c0_4 = arith.constant 0 : index
    %5 = vector.load %arg3[%c0_3, %c0_4] : memref<16x32xf32, #tpu.memory_space<vmem>>, vector<16x32xf32>
    %cst = arith.constant dense<0.000000e+00> : vector<2x32xf32>
    %6 = tpu.matmul %4, %5, %cst {dimension_numbers = #tpu.dot_dimension_numbers<[1], [0], [0], [1], [0, 0, 1, 1], [], []>} : vector<2x16xf32>, vector<16x32xf32>, vector<2x32xf32> -> vector<2x32xf32>
    %c0_5 = arith.constant 0 : index
    %c0_6 = arith.constant 0 : index
    %7 = vector.load %arg5[%c0_5, %c0_6] : memref<1x32xf32, #tpu.memory_space<vmem>>, vector<1x32xf32>
    %8 = vector.broadcast %7 : vector<1x32xf32> to vector<2x32xf32>
    %9 = arith.addf %6, %8 : vector<2x32xf32>
    %c0_7 = arith.constant 0 : index
    %c0_8 = arith.constant 0 : index
    %10 = vector.load %arg9[%c0_7, %c0_8] : memref<16x32xf32, #tpu.memory_space<vmem>>, vector<2x32xf32>
    tpu.vector_store %arg9[%c0_7, %c0_8], %9 {strides = array<i32>} : memref<16x32xf32, #tpu.memory_space<vmem>>, vector<2x32xf32>,
    %c1 = arith.constant 1 : index
    %c0_9 = arith.constant 0 : index
    %c0_10 = arith.constant 0 : index
    %11 = vector.load %arg2[%c1, %c0_9, %c0_10] : memref<8x2x16xf32, #tpu.memory_space<vmem>>, vector<1x2x16xf32>
    %12 = vector.shape_cast %11 : vector<1x2x16xf32> to vector<2x16xf32>
    %c0_11 = arith.constant 0 : index
    %c0_12 = arith.constant 0 : index
    %13 = vector.load %arg3[%c0_11, %c0_12] : memref<16x32xf32, #tpu.memory_space<vmem>>, vector<16x32xf32>
    %cst_13 = arith.constant dense<0.000000e+00> : vector<2x32xf32>
    %14 = tpu.matmul %12, %13, %cst_13 {dimension_numbers = #tpu.dot_dimension_numbers<[1], [0], [0], [1], [0, 0, 1, 1], [], []>} : vector<2x16xf32>, vector<16x32xf32>, vector<2x32xf32> -> vector<2x32xf32>
    %c0_14 = arith.constant 0 : index
    %c0_15 = arith.constant 0 : index
    %15 = vector.load %arg5[%c0_14, %c0_15] : memref<1x32xf32, #tpu.memory_space<vmem>>, vector<1x32xf32>
    %16 = vector.broadcast %15 : vector<1x32xf32> to vector<2x32xf32>
    %17 = arith.addf %14, %16 : vector<2x32xf32>
    %c2 = arith.constant 2 : index
    %c0_16 = arith.constant 0 : index
    %18 = vector.load %arg9[%c2, %c0_16] : memref<16x32xf32, #tpu.memory_space<vmem>>, vector<2x32xf32>
    tpu.vector_store %arg9[%c2, %c0_16], %17 {strides = array<i32>} : memref<16x32xf32, #tpu.memory_space<vmem>>, vector<2x32xf32>,
    %c2_17 = arith.constant 2 : index
    %c0_18 = arith.constant 0 : index
    %c0_19 = arith.constant 0 : index
    %19 = vector.load %arg2[%c2_17, %c0_18, %c0_19] : memref<8x2x16xf32, #tpu.memory_space<vmem>>, vector<1x2x16xf32>
    %20 = vector.shape_cast %19 : vector<1x2x16xf32> to vector<2x16xf32>
    %c0_20 = arith.constant 0 : index
    %c0_21 = arith.constant 0 : index
    %21 = vector.load %arg3[%c0_20, %c0_21] : memref<16x32xf32, #tpu.memory_space<vmem>>, vector<16x32xf32>
    %cst_22 = arith.constant dense<0.000000e+00> : vector<2x32xf32>
    %22 = tpu.matmul %20, %21, %cst_22 {dimension_numbers = #tpu.dot_dimension_numbers<[1], [0], [0], [1], [0, 0, 1, 1], [], []>} : vector<2x16xf32>, vector<16x32xf32>, vector<2x32xf32> -> vector<2x32xf32>
    %c0_23 = arith.constant 0 : index
    %c0_24 = arith.constant 0 : index
    %23 = vector.load %arg5[%c0_23, %c0_24] : memref<1x32xf32, #tpu.memory_space<vmem>>, vector<1x32xf32>
    %24 = vector.broadcast %23 : vector<1x32xf32> to vector<2x32xf32>
    %25 = arith.addf %22, %24 : vector<2x32xf32>
    %c4 = arith.constant 4 : index
    %c0_25 = arith.constant 0 : index
    %26 = vector.load %arg9[%c4, %c0_25] : memref<16x32xf32, #tpu.memory_space<vmem>>, vector<2x32xf32>
    tpu.vector_store %arg9[%c4, %c0_25], %25 {strides = array<i32>} : memref<16x32xf32, #tpu.memory_space<vmem>>, vector<2x32xf32>,
    %c3 = arith.constant 3 : index
    %c0_26 = arith.constant 0 : index
    %c0_27 = arith.constant 0 : index
    %27 = vector.load %arg2[%c3, %c0_26, %c0_27] : memref<8x2x16xf32, #tpu.memory_space<vmem>>, vector<1x2x16xf32>
    %28 = vector.shape_cast %27 : vector<1x2x16xf32> to vector<2x16xf32>
    %c0_28 = arith.constant 0 : index
    %c0_29 = arith.constant 0 : index
    %29 = vector.load %arg3[%c0_28, %c0_29] : memref<16x32xf32, #tpu.memory_space<vmem>>, vector<16x32xf32>
    %cst_30 = arith.constant dense<0.000000e+00> : vector<2x32xf32>
    %30 = tpu.matmul %28, %29, %cst_30 {dimension_numbers = #tpu.dot_dimension_numbers<[1], [0], [0], [1], [0, 0, 1, 1], [], []>} : vector<2x16xf32>, vector<16x32xf32>, vector<2x32xf32> -> vector<2x32xf32>
    %c0_31 = arith.constant 0 : index
    %c0_32 = arith.constant 0 : index
    %31 = vector.load %arg5[%c0_31, %c0_32] : memref<1x32xf32, #tpu.memory_space<vmem>>, vector<1x32xf32>
    %32 = vector.broadcast %31 : vector<1x32xf32> to vector<2x32xf32>
    %33 = arith.addf %30, %32 : vector<2x32xf32>
    %c6 = arith.constant 6 : index
    %c0_33 = arith.constant 0 : index
    %34 = vector.load %arg9[%c6, %c0_33] : memref<16x32xf32, #tpu.memory_space<vmem>>, vector<2x32xf32>
    tpu.vector_store %arg9[%c6, %c0_33], %33 {strides = array<i32>} : memref<16x32xf32, #tpu.memory_space<vmem>>, vector<2x32xf32>,
    %c4_34 = arith.constant 4 : index
    %c0_35 = arith.constant 0 : index
    %c0_36 = arith.constant 0 : index
    %35 = vector.load %arg2[%c4_34, %c0_35, %c0_36] : memref<8x2x16xf32, #tpu.memory_space<vmem>>, vector<1x2x16xf32>
    %36 = vector.shape_cast %35 : vector<1x2x16xf32> to vector<2x16xf32>
    %c0_37 = arith.constant 0 : index
    %c0_38 = arith.constant 0 : index
    %37 = vector.load %arg3[%c0_37, %c0_38] : memref<16x32xf32, #tpu.memory_space<vmem>>, vector<16x32xf32>
    %cst_39 = arith.constant dense<0.000000e+00> : vector<2x32xf32>
    %38 = tpu.matmul %36, %37, %cst_39 {dimension_numbers = #tpu.dot_dimension_numbers<[1], [0], [0], [1], [0, 0, 1, 1], [], []>} : vector<2x16xf32>, vector<16x32xf32>, vector<2x32xf32> -> vector<2x32xf32>
    %c0_40 = arith.constant 0 : index
    %c0_41 = arith.constant 0 : index
    %39 = vector.load %arg5[%c0_40, %c0_41] : memref<1x32xf32, #tpu.memory_space<vmem>>, vector<1x32xf32>
    %40 = vector.broadcast %39 : vector<1x32xf32> to vector<2x32xf32>
    %41 = arith.addf %38, %40 : vector<2x32xf32>
    %c8 = arith.constant 8 : index
    %c0_42 = arith.constant 0 : index
    %42 = vector.load %arg9[%c8, %c0_42] : memref<16x32xf32, #tpu.memory_space<vmem>>, vector<2x32xf32>
    tpu.vector_store %arg9[%c8, %c0_42], %41 {strides = array<i32>} : memref<16x32xf32, #tpu.memory_space<vmem>>, vector<2x32xf32>,
    %c5 = arith.constant 5 : index
    %c0_43 = arith.constant 0 : index
    %c0_44 = arith.constant 0 : index
    %43 = vector.load %arg2[%c5, %c0_43, %c0_44] : memref<8x2x16xf32, #tpu.memory_space<vmem>>, vector<1x2x16xf32>
    %44 = vector.shape_cast %43 : vector<1x2x16xf32> to vector<2x16xf32>
    %c0_45 = arith.constant 0 : index
    %c0_46 = arith.constant 0 : index
    %45 = vector.load %arg3[%c0_45, %c0_46] : memref<16x32xf32, #tpu.memory_space<vmem>>, vector<16x32xf32>
    %cst_47 = arith.constant dense<0.000000e+00> : vector<2x32xf32>
    %46 = tpu.matmul %44, %45, %cst_47 {dimension_numbers = #tpu.dot_dimension_numbers<[1], [0], [0], [1], [0, 0, 1, 1], [], []>} : vector<2x16xf32>, vector<16x32xf32>, vector<2x32xf32> -> vector<2x32xf32>
    %c0_48 = arith.constant 0 : index
    %c0_49 = arith.constant 0 : index
    %47 = vector.load %arg5[%c0_48, %c0_49] : memref<1x32xf32, #tpu.memory_space<vmem>>, vector<1x32xf32>
    %48 = vector.broadcast %47 : vector<1x32xf32> to vector<2x32xf32>
    %49 = arith.addf %46, %48 : vector<2x32xf32>
    %c10 = arith.constant 10 : index
    %c0_50 = arith.constant 0 : index
    %50 = vector.load %arg9[%c10, %c0_50] : memref<16x32xf32, #tpu.memory_space<vmem>>, vector<2x32xf32>
    tpu.vector_store %arg9[%c10, %c0_50], %49 {strides = array<i32>} : memref<16x32xf32, #tpu.memory_space<vmem>>, vector<2x32xf32>,
    %c6_51 = arith.constant 6 : index
    %c0_52 = arith.constant 0 : index
    %c0_53 = arith.constant 0 : index
    %51 = vector.load %arg2[%c6_51, %c0_52, %c0_53] : memref<8x2x16xf32, #tpu.memory_space<vmem>>, vector<1x2x16xf32>
    %52 = vector.shape_cast %51 : vector<1x2x16xf32> to vector<2x16xf32>
    %c0_54 = arith.constant 0 : index
    %c0_55 = arith.constant 0 : index
    %53 = vector.load %arg3[%c0_54, %c0_55] : memref<16x32xf32, #tpu.memory_space<vmem>>, vector<16x32xf32>
    %cst_56 = arith.constant dense<0.000000e+00> : vector<2x32xf32>
    %54 = tpu.matmul %52, %53, %cst_56 {dimension_numbers = #tpu.dot_dimension_numbers<[1], [0], [0], [1], [0, 0, 1, 1], [], []>} : vector<2x16xf32>, vector<16x32xf32>, vector<2x32xf32> -> vector<2x32xf32>
    %c0_57 = arith.constant 0 : index
    %c0_58 = arith.constant 0 : index
    %55 = vector.load %arg5[%c0_57, %c0_58] : memref<1x32xf32, #tpu.memory_space<vmem>>, vector<1x32xf32>
    %56 = vector.broadcast %55 : vector<1x32xf32> to vector<2x32xf32>
    %57 = arith.addf %54, %56 : vector<2x32xf32>
    %c12 = arith.constant 12 : index
    %c0_59 = arith.constant 0 : index
    %58 = vector.load %arg9[%c12, %c0_59] : memref<16x32xf32, #tpu.memory_space<vmem>>, vector<2x32xf32>
    tpu.vector_store %arg9[%c12, %c0_59], %57 {strides = array<i32>} : memref<16x32xf32, #tpu.memory_space<vmem>>, vector<2x32xf32>,
    %c7 = arith.constant 7 : index
    %c0_60 = arith.constant 0 : index
    %c0_61 = arith.constant 0 : index
    %59 = vector.load %arg2[%c7, %c0_60, %c0_61] : memref<8x2x16xf32, #tpu.memory_space<vmem>>, vector<1x2x16xf32>
    %60 = vector.shape_cast %59 : vector<1x2x16xf32> to vector<2x16xf32>
    %c0_62 = arith.constant 0 : index
    %c0_63 = arith.constant 0 : index
    %61 = vector.load %arg3[%c0_62, %c0_63] : memref<16x32xf32, #tpu.memory_space<vmem>>, vector<16x32xf32>
    %cst_64 = arith.constant dense<0.000000e+00> : vector<2x32xf32>
    %62 = tpu.matmul %60, %61, %cst_64 {dimension_numbers = #tpu.dot_dimension_numbers<[1], [0], [0], [1], [0, 0, 1, 1], [], []>} : vector<2x16xf32>, vector<16x32xf32>, vector<2x32xf32> -> vector<2x32xf32>
    %c0_65 = arith.constant 0 : index
    %c0_66 = arith.constant 0 : index
    %63 = vector.load %arg5[%c0_65, %c0_66] : memref<1x32xf32, #tpu.memory_space<vmem>>, vector<1x32xf32>
    %64 = vector.broadcast %63 : vector<1x32xf32> to vector<2x32xf32>
    %65 = arith.addf %62, %64 : vector<2x32xf32>
    %c14 = arith.constant 14 : index
    %c0_67 = arith.constant 0 : index
    %66 = vector.load %arg9[%c14, %c0_67] : memref<16x32xf32, #tpu.memory_space<vmem>>, vector<2x32xf32>
    tpu.vector_store %arg9[%c14, %c0_67], %65 {strides = array<i32>} : memref<16x32xf32, #tpu.memory_space<vmem>>, vector<2x32xf32>,
    %c0_68 = arith.constant 0 : index
    %c0_69 = arith.constant 0 : index
    %67 = vector.load %arg10[%c0_68, %c0_69] : memref<2x32xf32, #tpu.memory_space<vmem>>, vector<2x32xf32>
    %c0_70 = arith.constant 0 : index
    %c0_71 = arith.constant 0 : index
    %68 = vector.load %arg9[%c0_70, %c0_71] : memref<16x32xf32, #tpu.memory_space<vmem>>, vector<2x32xf32>
    %c0_72 = arith.constant 0 : index
    %c0_73 = arith.constant 0 : index
    %69 = vector.load %arg4[%c0_72, %c0_73] : memref<32x32xf32, #tpu.memory_space<vmem>>, vector<32x32xf32>
    %cst_74 = arith.constant dense<0.000000e+00> : vector<2x32xf32>
    %70 = tpu.matmul %67, %69, %cst_74 {dimension_numbers = #tpu.dot_dimension_numbers<[1], [0], [0], [1], [0, 0, 1, 1], [], []>} : vector<2x32xf32>, vector<32x32xf32>, vector<2x32xf32> -> vector<2x32xf32>
    %71 = arith.addf %68, %70 : vector<2x32xf32>
    %72 = math.tanh %71 : vector<2x32xf32>
    %c2_75 = arith.constant 2 : index
    %c0_76 = arith.constant 0 : index
    %73 = vector.load %arg9[%c2_75, %c0_76] : memref<16x32xf32, #tpu.memory_space<vmem>>, vector<2x32xf32>
    %c0_77 = arith.constant 0 : index
    %c0_78 = arith.constant 0 : index
    %74 = vector.load %arg4[%c0_77, %c0_78] : memref<32x32xf32, #tpu.memory_space<vmem>>, vector<32x32xf32>
    %cst_79 = arith.constant dense<0.000000e+00> : vector<2x32xf32>
    %75 = tpu.matmul %72, %74, %cst_79 {dimension_numbers = #tpu.dot_dimension_numbers<[1], [0], [0], [1], [0, 0, 1, 1], [], []>} : vector<2x32xf32>, vector<32x32xf32>, vector<2x32xf32> -> vector<2x32xf32>
    %76 = arith.addf %73, %75 : vector<2x32xf32>
    %77 = math.tanh %76 : vector<2x32xf32>
    %c4_80 = arith.constant 4 : index
    %c0_81 = arith.constant 0 : index
    %78 = vector.load %arg9[%c4_80, %c0_81] : memref<16x32xf32, #tpu.memory_space<vmem>>, vector<2x32xf32>
    %c0_82 = arith.constant 0 : index
    %c0_83 = arith.constant 0 : index
    %79 = vector.load %arg4[%c0_82, %c0_83] : memref<32x32xf32, #tpu.memory_space<vmem>>, vector<32x32xf32>
    %cst_84 = arith.constant dense<0.000000e+00> : vector<2x32xf32>
    %80 = tpu.matmul %77, %79, %cst_84 {dimension_numbers = #tpu.dot_dimension_numbers<[1], [0], [0], [1], [0, 0, 1, 1], [], []>} : vector<2x32xf32>, vector<32x32xf32>, vector<2x32xf32> -> vector<2x32xf32>
    %81 = arith.addf %78, %80 : vector<2x32xf32>
    %82 = math.tanh %81 : vector<2x32xf32>
    %c6_85 = arith.constant 6 : index
    %c0_86 = arith.constant 0 : index
    %83 = vector.load %arg9[%c6_85, %c0_86] : memref<16x32xf32, #tpu.memory_space<vmem>>, vector<2x32xf32>
    %c0_87 = arith.constant 0 : index
    %c0_88 = arith.constant 0 : index
    %84 = vector.load %arg4[%c0_87, %c0_88] : memref<32x32xf32, #tpu.memory_space<vmem>>, vector<32x32xf32>
    %cst_89 = arith.constant dense<0.000000e+00> : vector<2x32xf32>
    %85 = tpu.matmul %82, %84, %cst_89 {dimension_numbers = #tpu.dot_dimension_numbers<[1], [0], [0], [1], [0, 0, 1, 1], [], []>} : vector<2x32xf32>, vector<32x32xf32>, vector<2x32xf32> -> vector<2x32xf32>
    %86 = arith.addf %83, %85 : vector<2x32xf32>
    %87 = math.tanh %86 : vector<2x32xf32>
    %c8_90 = arith.constant 8 : index
    %c0_91 = arith.constant 0 : index
    %88 = vector.load %arg9[%c8_90, %c0_91] : memref<16x32xf32, #tpu.memory_space<vmem>>, vector<2x32xf32>
    %c0_92 = arith.constant 0 : index
    %c0_93 = arith.constant 0 : index
    %89 = vector.load %arg4[%c0_92, %c0_93] : memref<32x32xf32, #tpu.memory_space<vmem>>, vector<32x32xf32>
    %cst_94 = arith.constant dense<0.000000e+00> : vector<2x32xf32>
    %90 = tpu.matmul %87, %89, %cst_94 {dimension_numbers = #tpu.dot_dimension_numbers<[1], [0], [0], [1], [0, 0, 1, 1], [], []>} : vector<2x32xf32>, vector<32x32xf32>, vector<2x32xf32> -> vector<2x32xf32>
    %91 = arith.addf %88, %90 : vector<2x32xf32>
    %92 = math.tanh %91 : vector<2x32xf32>
    %c10_95 = arith.constant 10 : index
    %c0_96 = arith.constant 0 : index
    %93 = vector.load %arg9[%c10_95, %c0_96] : memref<16x32xf32, #tpu.memory_space<vmem>>, vector<2x32xf32>
    %c0_97 = arith.constant 0 : index
    %c0_98 = arith.constant 0 : index
    %94 = vector.load %arg4[%c0_97, %c0_98] : memref<32x32xf32, #tpu.memory_space<vmem>>, vector<32x32xf32>
    %cst_99 = arith.constant dense<0.000000e+00> : vector<2x32xf32>
    %95 = tpu.matmul %92, %94, %cst_99 {dimension_numbers = #tpu.dot_dimension_numbers<[1], [0], [0], [1], [0, 0, 1, 1], [], []>} : vector<2x32xf32>, vector<32x32xf32>, vector<2x32xf32> -> vector<2x32xf32>
    %96 = arith.addf %93, %95 : vector<2x32xf32>
    %97 = math.tanh %96 : vector<2x32xf32>
    %c12_100 = arith.constant 12 : index
    %c0_101 = arith.constant 0 : index
    %98 = vector.load %arg9[%c12_100, %c0_101] : memref<16x32xf32, #tpu.memory_space<vmem>>, vector<2x32xf32>
    %c0_102 = arith.constant 0 : index
    %c0_103 = arith.constant 0 : index
    %99 = vector.load %arg4[%c0_102, %c0_103] : memref<32x32xf32, #tpu.memory_space<vmem>>, vector<32x32xf32>
    %cst_104 = arith.constant dense<0.000000e+00> : vector<2x32xf32>
    %100 = tpu.matmul %97, %99, %cst_104 {dimension_numbers = #tpu.dot_dimension_numbers<[1], [0], [0], [1], [0, 0, 1, 1], [], []>} : vector<2x32xf32>, vector<32x32xf32>, vector<2x32xf32> -> vector<2x32xf32>
    %101 = arith.addf %98, %100 : vector<2x32xf32>
    %102 = math.tanh %101 : vector<2x32xf32>
    %c14_105 = arith.constant 14 : index
    %c0_106 = arith.constant 0 : index
    %103 = vector.load %arg9[%c14_105, %c0_106] : memref<16x32xf32, #tpu.memory_space<vmem>>, vector<2x32xf32>
    %c0_107 = arith.constant 0 : index
    %c0_108 = arith.constant 0 : index
    %104 = vector.load %arg4[%c0_107, %c0_108] : memref<32x32xf32, #tpu.memory_space<vmem>>, vector<32x32xf32>
    %cst_109 = arith.constant dense<0.000000e+00> : vector<2x32xf32>
    %105 = tpu.matmul %102, %104, %cst_109 {dimension_numbers = #tpu.dot_dimension_numbers<[1], [0], [0], [1], [0, 0, 1, 1], [], []>} : vector<2x32xf32>, vector<32x32xf32>, vector<2x32xf32> -> vector<2x32xf32>
    %106 = arith.addf %103, %105 : vector<2x32xf32>
    %107 = math.tanh %106 : vector<2x32xf32>
    %c0_110 = arith.constant 0 : index
    %c0_111 = arith.constant 0 : index
    %108 = vector.load %arg10[%c0_110, %c0_111] : memref<2x32xf32, #tpu.memory_space<vmem>>, vector<2x32xf32>
    tpu.vector_store %arg10[%c0_110, %c0_111], %107 {strides = array<i32>} : memref<2x32xf32, #tpu.memory_space<vmem>>, vector<2x32xf32>,
    %c1_i32 = arith.constant 1 : i32
    %109 = arith.cmpi eq, %arg1, %c1_i32 : i32
    %110 = arith.extui %109 : i1 to i32
    %c0_i32_112 = arith.constant 0 : i32
    %111 = arith.cmpi ne, %110, %c0_i32_112 : i32
    scf.if %111 {
      %c0_113 = arith.constant 0 : index
      %c0_114 = arith.constant 0 : index
      %112 = vector.load %arg6[%c0_113, %c0_114] : memref<32x16xf32, #tpu.memory_space<vmem>>, vector<32x16xf32>
      %cst_115 = arith.constant dense<0.000000e+00> : vector<2x16xf32>
      %113 = tpu.matmul %107, %112, %cst_115 {dimension_numbers = #tpu.dot_dimension_numbers<[1], [0], [0], [1], [0, 0, 1, 1], [], []>} : vector<2x32xf32>, vector<32x16xf32>, vector<2x16xf32> -> vector<2x16xf32>
      %c0_116 = arith.constant 0 : index
      %c0_117 = arith.constant 0 : index
      %114 = vector.load %arg7[%c0_116, %c0_117] : memref<1x16xf32, #tpu.memory_space<vmem>>, vector<1x16xf32>
      %115 = vector.broadcast %114 : vector<1x16xf32> to vector<2x16xf32>
      %116 = arith.addf %113, %115 : vector<2x16xf32>
      %c0_118 = arith.constant 0 : index
      %c0_119 = arith.constant 0 : index
      %117 = vector.load %arg8[%c0_118, %c0_119] : memref<2x16xf32, #tpu.memory_space<vmem>>, vector<2x16xf32>
      tpu.vector_store %arg8[%c0_118, %c0_119], %116 {strides = array<i32>} : memref<2x16xf32, #tpu.memory_space<vmem>>, vector<2x16xf32>,
    } else {
    }
    return
  }
  func.func @transform_0(%arg0: i32, %arg1: i32) -> (i32, i32, i32) {
    %c0_i32 = arith.constant 0 : i32
    %c0_i32_0 = arith.constant 0 : i32
    return %arg1, %arg0, %c0_i32 : i32, i32, i32
  }
  func.func @transform_1(%arg0: i32, %arg1: i32) -> (i32, i32) {
    %c0_i32 = arith.constant 0 : i32
    %c0_i32_0 = arith.constant 0 : i32
    %c0_i32_1 = arith.constant 0 : i32
    return %c0_i32, %c0_i32_0 : i32, i32
  }
  func.func @transform_2(%arg0: i32, %arg1: i32) -> (i32, i32) {
    %c0_i32 = arith.constant 0 : i32
    %c0_i32_0 = arith.constant 0 : i32
    %c0_i32_1 = arith.constant 0 : i32
    return %c0_i32, %c0_i32_0 : i32, i32
  }
  func.func @transform_3(%arg0: i32, %arg1: i32) -> (i32, i32) {
    %c0_i32 = arith.constant 0 : i32
    %c0_i32_0 = arith.constant 0 : i32
    %c0_i32_1 = arith.constant 0 : i32
    return %c0_i32, %c0_i32_0 : i32, i32
  }
  func.func @transform_4(%arg0: i32, %arg1: i32) -> (i32, i32) {
    %c0_i32 = arith.constant 0 : i32
    %c0_i32_0 = arith.constant 0 : i32
    %c0_i32_1 = arith.constant 0 : i32
    return %c0_i32, %c0_i32_0 : i32, i32
  }
  func.func @transform_5(%arg0: i32, %arg1: i32) -> (i32, i32) {
    %c0_i32 = arith.constant 0 : i32
    %c0_i32_0 = arith.constant 0 : i32
    %c0_i32_1 = arith.constant 0 : i32
    return %c0_i32, %c0_i32_0 : i32, i32
  }
  func.func @transform_6(%arg0: i32, %arg1: i32) -> (i32, i32) {
    %c0_i32 = arith.constant 0 : i32
    %c0_i32_0 = arith.constant 0 : i32
    return %arg0, %c0_i32 : i32, i32
  }
}

</mosaic_0001>

<bundles_post_ra>
// kernel: rnn_net_forward.1
= control target key start
LH: loop header
LB: loop body
LE: loop exit
PB: predicated region body
PF: predicated region fallthrough
CT: control target
= control target key end

     0   :  { %11 = vsyncpa [#allocation5], 0  ;;  %s1033_s21 = smov 0   ;;  %s1035_s22 = smov 0   ;;  %s1207_s0 = inlined_call_operand.vmem [shape: f32[16,2,16], index: 0, kind: input, shape index: {}]   ;;  %s1208_s1 = inlined_call_operand.vmem [shape: f32[16,32], index: 1, kind: input, shape index: {}]   ;;  %s1209_s2 = inlined_call_operand.vmem [shape: f32[32,32], index: 2, kind: input, shape index: {}]   ;;  %s1210_s3 = inlined_call_operand.vmem [shape: f32[1,32], index: 3, kind: input, shape index: {}]   ;;  %s1211_s4 = inlined_call_operand.vmem [shape: f32[32,16], index: 4, kind: input, shape index: {}]   ;;  %s1212_s5 = inlined_call_operand.vmem [shape: f32[1,16], index: 5, kind: input, shape index: {}]   ;;  %s1213_s6 = inlined_call_operand.hbm [shape: f32[2,16], index: 6, kind: output, shape index: {}]  }
   0x1   :  { %s1037_s23 = smov 0  }
   0x2 LB: > { %s847_s24 = sadd.s32 4294967295, %s994_s23   ;;  %s26_s25 = sadd.s32 1, %s990_s22  ;;  %s994_s23 = sphi %s1037_s23, %s17_s23   ;;  %s990_s22 = sphi %s1035_s22, %s1215_s22   ;;  %s986_s21 = sphi %s1033_s21, %s1214_s21  }
   0x3   : > { %p27_p0 = scmp.ge.s32.totalorder %s26_s25, 2  ;;  %p850_p1 = scmp.ge.s32.totalorder %s994_s23, 1 }
   0x4   : > { %p231_p2 = scmp.lt.s32.totalorder %s994_s23, 3 }
   0x5   : > { %s1217_s25 = smov (%p27_p0, %s26_s25), 0 }
   0x6   : > { %p232_p3 = pnand %p850_p1, %p231_p2 }
   0x7   : > { %s851_s26 = sshll.u32 (!%p232_p3), %s986_s21, 3  ;;  %p853_p5 = scmp.ne.s32.totalorder (!%p232_p3), %s986_s21, 0 }
   0x8   : > { %235 = sbr.rel (%p232_p3) target bundleno = 1288 (0x508), region = 44  ;;  %p260_p4 = scmp.lt.s32.totalorder (!%p232_p3), %s851_s26, 15 }
   0xd   : > { %s1219_s26 = smov (!%p260_p4, %s851_s26), 15  ;;  %271 = sbr.rel (%p853_p5) target bundleno = 20 (0x14), region = 48 }
   0xe   : > { %s852_s27 = sshll.u32 %s1219_s26, 1 }
   0xf   : > { %s1058_s30 = scalar_lea.vmem %s1207_s0, %s852_s27 }
  0x12   : > { %vm272_vm0 = vcmask 254976   ;;  %v996_v0 = vmov 0.0  }
  0x13   : > { %273 = vst.msk [vmem:[#allocation3] sm:$0x3] %vm272_vm0, %v996_v0 }
  0x14 PF: > { %v276_v1 = vld [vmem:[%s1208_s1 + $0x8] sm:$0xff]  ;;  %v275_v2 = vld [vmem:[%s1208_s1] sm:$0xff]  ;;  %vm281_vm1 = vcmask 130048   ;;  %v1071_v4 = vld [vmem:[%s1209_s2 + $0x18] sm:$0xff]  ;;  %vm537_vm2 = vcmask 261120   ;;  %vm305_vm3 = vcmask 254976  }
  0x15   : > { %299 = vmatpush.msra.mxu0 %v276_v1  ;;  %v274_v3 = vld [vmem:[%s1058_s30] sm:$0x3]  ;;  %332 = vmatpush.msra.mxu1 %v276_v1  ;;  %v1077_v5 = vld [vmem:[%s1209_s2 + $0x10] sm:$0xff]  ;;  %v861_v6 = vld [vmem:[%s1058_s30 + $0x8] sm:$0x3]  ;;  %p877_p6 = scmp.ne.s32.totalorder %s986_s21, 1 }
  0x16   : > { %364 = vmatpush.msra.mxu2 %v276_v1  ;;  %396 = vmatpush.msra.mxu3 %v276_v1  ;;  %v1085_v7 = vld [vmem:[%s1209_s2 + $0x8] sm:$0xff]  ;;  %v1091_v8 = vld [vmem:[%s1209_s2] sm:$0xff] }
  0x17   : > { %300 = vmatpush.msra.mxu0 %v275_v2  ;;  %333 = vmatpush.msra.mxu1 %v275_v2  ;;  %v855_v10 = vld [vmem:[%s1058_s30 + $0x2] sm:$0x3]  ;;  %v863_v11 = vld [vmem:[%s1058_s30 + $0xa] sm:$0x3]  ;;  %v915_v12 = vld [vmem:[%s1210_s3] ss:$0 sm:$0xff] }
  0x18   : > { %854 = vmatmul.msk.f32.vlgmr.msra.gmra.mxu0 %vm281_vm1, %v274_v3  ;;  %365 = vmatpush.msra.mxu2 %v275_v2  ;;  %v916_v15 = vld [vmem:[%s1210_s3] ss:$0 sm:$0xff]  ;;  %v857_v22 = vld [vmem:[%s1058_s30 + $0x4] sm:$0x3]  ;;  %v865_v29 = vld [vmem:[%s1058_s30 + $0xc] sm:$0x3] }
  0x19   : > { %460 = vmatpush.msrb.mxu1 %v276_v1  ;;  %428 = vmatpush.msrb.mxu0 %v276_v1  ;;  %v917_v23 = vld [vmem:[%s1210_s3] ss:$0 sm:$0xff]  ;;  %v859_v37 = vld [vmem:[%s1058_s30 + $0x6] sm:$0x3]  ;;  %v867_v41 = vld [vmem:[%s1058_s30 + $0xe] sm:$0x3] }
  0x1a   : > { %492 = vmatpush.msrb.mxu2 %v276_v1  ;;  %397 = vmatpush.msra.mxu3 %v275_v2  ;;  %v531_v9 = vld [vmem:[#allocation3] sm:$0x3]  ;;  %v918_v26 = vld [vmem:[%s1210_s3] ss:$0 sm:$0xff] }
  0x1b   : > { %461 = vmatpush.msrb.mxu1 %v275_v2  ;;  %429 = vmatpush.msrb.mxu0 %v275_v2  ;;  %v919_v34 = vld [vmem:[%s1210_s3] ss:$0 sm:$0xff] }
  0x1c   : > { %493 = vmatpush.msrb.mxu2 %v275_v2  ;;  %524 = vmatpush.msrb.mxu3 %v276_v1  ;;  %v920_v38 = vld [vmem:[%s1210_s3] ss:$0 sm:$0xff] }
  0x1d   : > { %553 = vmatpush.msra.mxu0 %v1071_v4  ;;  %856 = vmatmul.msk.f32.vlgmr.msra.gmra.mxu1 %vm281_vm1, %v855_v10  ;;  %v921_v46 = vld [vmem:[%s1210_s3] ss:$0 sm:$0xff] }
  0x1e   : > { %525 = vmatpush.msrb.mxu3 %v275_v2  ;;  %579 = vmatpush.msra.mxu1 %v1071_v4  ;;  %v922_v49 = vld [vmem:[%s1210_s3] ss:$0 sm:$0xff] }
  0x1f   : > { %554 = vmatpush.msra.mxu0 %v1077_v5  ;;  %858 = vmatmul.msk.f32.vlgmr.msra.gmra.mxu2 %vm281_vm1, %v857_v22 }
  0x20   : > { %862 = vmatmul.msk.f32.vlgmr.msrb.gmra.mxu0 %vm281_vm1, %v861_v6  ;;  %580 = vmatpush.msra.mxu1 %v1077_v5 }
  0x21   : > { %555 = vmatpush.msra.mxu0 %v1085_v7  ;;  %605 = vmatpush.msra.mxu2 %v1071_v4 }
  0x22   : > { %581 = vmatpush.msra.mxu1 %v1085_v7  ;;  %860 = vmatmul.msk.f32.vlgmr.msra.gmra.mxu3 %vm281_vm1, %v859_v37 }
  0x23   : > { %556 = vmatpush.msra.mxu0 %v1091_v8  ;;  %606 = vmatpush.msra.mxu2 %v1077_v5 }
  0x24   : > { %582 = vmatpush.msra.mxu1 %v1091_v8  ;;  %631 = vmatpush.msra.mxu3 %v1071_v4 }
  0x25   : > { %657 = vmatpush.msrb.mxu0 %v1071_v4  ;;  %864 = vmatmul.msk.f32.vlgmr.msrb.gmra.mxu1 %vm281_vm1, %v863_v11 }
  0x26   : > { %683 = vmatpush.msrb.mxu1 %v1071_v4  ;;  %607 = vmatpush.msra.mxu2 %v1085_v7 }
  0x27   : > { %658 = vmatpush.msrb.mxu0 %v1077_v5  ;;  %866 = vmatmul.msk.f32.vlgmr.msrb.gmra.mxu2 %vm281_vm1, %v865_v29 }
  0x28   : > { %869 = vmatmul.msk.f32.vlgmr.msra.gmra.mxu0 %vm537_vm2, %v531_v9  ;;  %684 = vmatpush.msrb.mxu1 %v1077_v5 }
  0x29   : > { %659 = vmatpush.msrb.mxu0 %v1085_v7  ;;  %608 = vmatpush.msra.mxu2 %v1091_v8 }
  0x2a   : > { %685 = vmatpush.msrb.mxu1 %v1085_v7  ;;  %632 = vmatpush.msra.mxu3 %v1077_v5 }
  0x2b   : > { %660 = vmatpush.msrb.mxu0 %v1091_v8  ;;  %709 = vmatpush.msrb.mxu2 %v1071_v4 }
  0x2c   : > { %686 = vmatpush.msrb.mxu1 %v1091_v8  ;;  %633 = vmatpush.msra.mxu3 %v1085_v7 }
  0x2d   : > { %710 = vmatpush.msrb.mxu2 %v1077_v5  ;;  %868 = vmatmul.msk.f32.vlgmr.msrb.gmra.mxu3 %vm281_vm1, %v867_v41 }
  0x2e   : > { %634 = vmatpush.msra.mxu3 %v1091_v8 }
  0x2f   : > { %711 = vmatpush.msrb.mxu2 %v1085_v7 }
  0x30   : > { %735 = vmatpush.msrb.mxu3 %v1071_v4 }
  0x31   : > { %712 = vmatpush.msrb.mxu2 %v1091_v8 }
  0x32   : > { %736 = vmatpush.msrb.mxu3 %v1077_v5 }
  0x34   : > { %737 = vmatpush.msrb.mxu3 %v1085_v7 }
  0x36   : > { %738 = vmatpush.msrb.mxu3 %v1091_v8 }
  0x95   : > { %v302_v13 = vpop.f32.mrf.mxu0 }
  0x96   : > { %v303_v14 = vadd.f32 %v915_v12, %v302_v13 }
  0x98   : > { %306 = vst.msk [vmem:[#allocation2] sm:$0x3] %vm305_vm3, %v303_v14 }
  0x9a   : > { %v335_v24 = vpop.f32.mrf.mxu1 }
  0x9b   : > { %v336_v25 = vadd.f32 %v917_v23, %v335_v24 }
  0x9d   : > { %v431_v16 = vpop.f32.mrf.mxu0  ;;  %338 = vst.msk [vmem:[#allocation2 + $0x2] sm:$0x3] %vm305_vm3, %v336_v25 }
  0x9e   : > { %v432_v17 = vadd.f32 %v916_v15, %v431_v16 }
  0x9f   : > { %v532_v18 = vld [vmem:[#allocation2] sm:$0x3] }
  0xa0   : > { %434 = vst.msk [vmem:[#allocation2 + $0x8] sm:$0x3] %vm305_vm3, %v432_v17 }
  0xa2   : > { %v463_v27 = vpop.f32.mrf.mxu1  ;;  %v367_v35 = vpop.f32.mrf.mxu2 }
  0xa3   : > { %v464_v28 = vadd.f32 %v918_v26, %v463_v27  ;;  %v368_v36 = vadd.f32 %v919_v34, %v367_v35 }
  0xa4   : > { %v563_v30 = vld [vmem:[#allocation2 + $0x2] sm:$0x3] }
  0xa5   : > { %v558_v19 = vpop.f32.mrf.mxu0  ;;  %466 = vst.msk [vmem:[#allocation2 + $0xa] sm:$0x3] %vm305_vm3, %v464_v28  ;;  %v399_v47 = vpop.f32.mrf.mxu3 }
  0xa6   : > { %v561_v20 = vadd.f32 %v558_v19, %v532_v18  ;;  %370 = vst.msk [vmem:[#allocation2 + $0x4] sm:$0x3] %vm305_vm3, %v368_v36  ;;  %v400_v48 = vadd.f32 %v921_v46, %v399_v47 }
  0xa7   : > { %v641_v56 = vld [vmem:[#allocation2 + $0x8] sm:$0x3] }
  0xa8   : > { %923 = vtanh.f32 %v561_v20  ;;  %402 = vst.msk [vmem:[#allocation2 + $0x6] sm:$0x3] %vm305_vm3, %v400_v48 }
  0xaa   : > { %v495_v39 = vpop.f32.mrf.mxu2 }
  0xab   : > { %v496_v40 = vadd.f32 %v920_v38, %v495_v39 }
  0xac   : > { %v667_v60 = vld [vmem:[#allocation2 + $0xa] sm:$0x3] }
  0xad   : > { %498 = vst.msk [vmem:[#allocation2 + $0xc] sm:$0x3] %vm305_vm3, %v496_v40  ;;  %v589_v42 = vld [vmem:[#allocation2 + $0x4] sm:$0x3] }
  0xae   : > { %v924_v21 = vpop.eup %923 }
  0xaf   : > { %870 = vmatmul.msk.f32.vlgmr.msra.gmra.mxu1 %vm537_vm2, %v924_v21  ;;  %v615_v52 = vld [vmem:[#allocation2 + $0x6] sm:$0x3] }
  0xb0   : > { %v527_v50 = vpop.f32.mrf.mxu3 }
  0xb1   : > { %v528_v51 = vadd.f32 %v922_v49, %v527_v50 }
  0xb3   : > { %530 = vst.msk [vmem:[#allocation2 + $0xe] sm:$0x3] %vm305_vm3, %v528_v51 }
  0xb4   : > { %v693_v0 = vld [vmem:[#allocation2 + $0xc] sm:$0x3] }
  0xba   : > { %v719_v4 = vld [vmem:[#allocation2 + $0xe] sm:$0x3] }
 0x12c   : > { %v584_v31 = vpop.f32.mrf.mxu1 }
 0x12d   : > { %v587_v32 = vadd.f32 %v584_v31, %v563_v30 }
 0x12f   : > { %925 = vtanh.f32 %v587_v32 }
 0x135   : > { %v926_v33 = vpop.eup %925 }
 0x136   : > { %871 = vmatmul.msk.f32.vlgmr.msra.gmra.mxu2 %vm537_vm2, %v926_v33 }
 0x1b9   : > { %v610_v43 = vpop.f32.mrf.mxu2 }
 0x1ba   : > { %v613_v44 = vadd.f32 %v610_v43, %v589_v42 }
 0x1bc   : > { %927 = vtanh.f32 %v613_v44 }
 0x1c2   : > { %v928_v45 = vpop.eup %927 }
 0x1c3   : > { %872 = vmatmul.msk.f32.vlgmr.msra.gmra.mxu3 %vm537_vm2, %v928_v45 }
 0x246   : > { %v636_v53 = vpop.f32.mrf.mxu3 }
 0x247   : > { %v639_v54 = vadd.f32 %v636_v53, %v615_v52 }
 0x249   : > { %929 = vtanh.f32 %v639_v54 }
 0x24f   : > { %v930_v55 = vpop.eup %929 }
 0x250   : > { %873 = vmatmul.msk.f32.vlgmr.msrb.gmra.mxu0 %vm537_vm2, %v930_v55 }
 0x2cd   : > { %v662_v57 = vpop.f32.mrf.mxu0 }
 0x2ce   : > { %v665_v58 = vadd.f32 %v662_v57, %v641_v56 }
 0x2d0   : > { %931 = vtanh.f32 %v665_v58 }
 0x2d6   : > { %v932_v59 = vpop.eup %931 }
 0x2d7   : > { %874 = vmatmul.msk.f32.vlgmr.msrb.gmra.mxu1 %vm537_vm2, %v932_v59 }
 0x354   : > { %v688_v61 = vpop.f32.mrf.mxu1 }
 0x355   : > { %v691_v62 = vadd.f32 %v688_v61, %v667_v60 }
 0x357   : > { %933 = vtanh.f32 %v691_v62 }
 0x35d   : > { %v934_v63 = vpop.eup %933 }
 0x35e   : > { %875 = vmatmul.msk.f32.vlgmr.msrb.gmra.mxu2 %vm537_vm2, %v934_v63 }
 0x3e1   : > { %v714_v1 = vpop.f32.mrf.mxu2 }
 0x3e2   : > { %v717_v2 = vadd.f32 %v714_v1, %v693_v0 }
 0x3e4   : > { %935 = vtanh.f32 %v717_v2 }
 0x3ea   : > { %v936_v3 = vpop.eup %935 }
 0x3eb   : > { %876 = vmatmul.msk.f32.vlgmr.msrb.gmra.mxu3 %vm537_vm2, %v936_v3 }
 0x46e   : > { %v740_v5 = vpop.f32.mrf.mxu3 }
 0x46f   : > { %v743_v6 = vadd.f32 %v740_v5, %v719_v4 }
 0x471   : > { %937 = vtanh.f32 %v743_v6 }
 0x474   : > { %749 = sbr.rel (%p877_p6) target bundleno = 1282 (0x502), region = 52 }
 0x477   : > { %v938_v7 = vpop.eup %937 }
 0x478   : > { %745 = vst.msk [vmem:[#allocation3] sm:$0x3] %vm305_vm3, %v938_v7 }
 0x479   : > { %v753_v8 = vld [vmem:[%s1211_s4 + $0x18] sm:$0xff]  ;;  %v752_v9 = vld [vmem:[%s1211_s4 + $0x10] sm:$0xff]  ;;  %v751_v10 = vld [vmem:[%s1211_s4 + $0x8] sm:$0xff]  ;;  %vm781_vm4 = vcmask 123904  }
 0x47a   : > { %773 = vmatpush.msra.mxu0 %v753_v8  ;;  %v750_v11 = vld [vmem:[%s1211_s4] sm:$0xff] }
 0x47b   : > { %v939_v12 = vld [vmem:[%s1212_s5] ss:$0 sm:$0xff] }
 0x47c   : > { %774 = vmatpush.msra.mxu0 %v752_v9 }
 0x47e   : > { %775 = vmatpush.msra.mxu0 %v751_v10 }
 0x480   : > { %776 = vmatpush.msra.mxu0 %v750_v11 }
 0x481   : > { %878 = vmatmul.msk.f32.vlgmr.msra.gmra.mxu0 %vm537_vm2, %v938_v7 }
 0x4fe   : > { %v778_v13 = vpop.f32.mrf.mxu0 }
 0x4ff   : > { %v779_v14 = vadd.f32 %v939_v12, %v778_v13 }
 0x501   : > { %782 = vst.msk [vmem:[#allocation4] sm:$0x3] %vm781_vm4, %v779_v14 }
 0x502 PF: > { %p887_p7 = scmp.eq.s32.totalorder %s847_s24, 1  ;;  %s793_s9 = sshll.u32 %s1213_s6, 4  ;;  %s794_s9 = int_to_ptr.hbm [resolvable:$true] %s793_s9 }
 0x503   : > { %s997_s10 = smov [#allocation4]  }
 0x504   : > { %s791_s11 = sshll.u32 %s997_s10, 4  ;;  %s792_s11 = int_to_ptr.vmem [resolvable:$true] %s791_s11 }
 0x505   : > { %884 = dma.vmem_to_hbm [thread:$0]  (%p887_p7), %s792_s11, 32, %s794_s9, [#allocation5]  }
 0x506   : > { %981 = dma.done.wait (%p887_p7), [#allocation5], 32  }
 0x507   : > { %983 = vsyncadd (%p887_p7), [#allocation5], 4294967264 }
 0x508 PF: > { %s17_s23 = sadd.s32 1, %s994_s23   ;;  %s1214_s21 = smov %s990_s22 }
 0x509   : > { %p14_p8 = scmp.ge.s32.totalorder %s17_s23, 4   ;;  %s1215_s22 = smov %s1217_s25 }
 0x50b   :  { %16 = sbr.rel (!%p14_p8) target bundleno = 2 (0x2), region = 87 }
 0x510   :  { %807 = vsyncpa [#allocation5], 1 }
 0x511   :  { %809 = vsyncpa [#allocation5 + $0x1], 1 }

// kernel: rnn_net_forward.1
= control target key start
LH: loop header
LB: loop body
LE: loop exit
PB: predicated region body
PF: predicated region fallthrough
CT: control target
= control target key end

     0   :  { %11 = vsyncpa [#allocation5], 0  ;;  %s1033_s21 = smov 0   ;;  %s1035_s22 = smov 0   ;;  %s1207_s0 = inlined_call_operand.vmem [shape: f32[16,2,16], index: 0, kind: input, shape index: {}]   ;;  %s1208_s1 = inlined_call_operand.vmem [shape: f32[16,32], index: 1, kind: input, shape index: {}]   ;;  %s1209_s2 = inlined_call_operand.vmem [shape: f32[32,32], index: 2, kind: input, shape index: {}]   ;;  %s1210_s3 = inlined_call_operand.vmem [shape: f32[1,32], index: 3, kind: input, shape index: {}]   ;;  %s1211_s4 = inlined_call_operand.vmem [shape: f32[32,16], index: 4, kind: input, shape index: {}]   ;;  %s1212_s5 = inlined_call_operand.vmem [shape: f32[1,16], index: 5, kind: input, shape index: {}]   ;;  %s1213_s6 = inlined_call_operand.hbm [shape: f32[2,16], index: 6, kind: output, shape index: {}]  }
   0x1   :  { %s1037_s23 = smov 0  }
   0x2 LB: > { %s847_s24 = sadd.s32 4294967295, %s994_s23   ;;  %s26_s25 = sadd.s32 1, %s990_s22  ;;  %s994_s23 = sphi %s1037_s23, %s17_s23   ;;  %s990_s22 = sphi %s1035_s22, %s1215_s22   ;;  %s986_s21 = sphi %s1033_s21, %s1214_s21  }
   0x3   : > { %p27_p0 = scmp.ge.s32.totalorder %s26_s25, 2  ;;  %p850_p1 = scmp.ge.s32.totalorder %s994_s23, 1 }
   0x4   : > { %p231_p2 = scmp.lt.s32.totalorder %s994_s23, 3 }
   0x5   : > { %s1217_s25 = smov (%p27_p0, %s26_s25), 0 }
   0x6   : > { %p232_p3 = pnand %p850_p1, %p231_p2 }
   0x7   : > { %s851_s26 = sshll.u32 (!%p232_p3), %s986_s21, 3  ;;  %p853_p5 = scmp.ne.s32.totalorder (!%p232_p3), %s986_s21, 0 }
   0x8   : > { %235 = sbr.rel (%p232_p3) target bundleno = 1288 (0x508), region = 44  ;;  %p260_p4 = scmp.lt.s32.totalorder (!%p232_p3), %s851_s26, 15 }
   0xd   : > { %s1219_s26 = smov (!%p260_p4, %s851_s26), 15  ;;  %271 = sbr.rel (%p853_p5) target bundleno = 20 (0x14), region = 48 }
   0xe   : > { %s852_s27 = sshll.u32 %s1219_s26, 1 }
   0xf   : > { %s1058_s30 = scalar_lea.vmem %s1207_s0, %s852_s27 }
  0x12   : > { %vm272_vm0 = vcmask 254976   ;;  %v996_v0 = vmov 0.0  }
  0x13   : > { %273 = vst.msk [vmem:[#allocation3] sm:$0x3] %vm272_vm0, %v996_v0 }
  0x14 PF: > { %v276_v1 = vld [vmem:[%s1208_s1 + $0x8] sm:$0xff]  ;;  %v275_v2 = vld [vmem:[%s1208_s1] sm:$0xff]  ;;  %vm281_vm1 = vcmask 130048   ;;  %v1071_v4 = vld [vmem:[%s1209_s2 + $0x18] sm:$0xff]  ;;  %vm537_vm2 = vcmask 261120   ;;  %vm305_vm3 = vcmask 254976  }
  0x15   : > { %299 = vmatpush.msra.mxu0 %v276_v1  ;;  %v274_v3 = vld [vmem:[%s1058_s30] sm:$0x3]  ;;  %332 = vmatpush.msra.mxu1 %v276_v1  ;;  %v1077_v5 = vld [vmem:[%s1209_s2 + $0x10] sm:$0xff]  ;;  %v861_v6 = vld [vmem:[%s1058_s30 + $0x8] sm:$0x3]  ;;  %p877_p6 = scmp.ne.s32.totalorder %s986_s21, 1 }
  0x16   : > { %364 = vmatpush.msra.mxu2 %v276_v1  ;;  %396 = vmatpush.msra.mxu3 %v276_v1  ;;  %v1085_v7 = vld [vmem:[%s1209_s2 + $0x8] sm:$0xff]  ;;  %v1091_v8 = vld [vmem:[%s1209_s2] sm:$0xff] }
  0x17   : > { %300 = vmatpush.msra.mxu0 %v275_v2  ;;  %333 = vmatpush.msra.mxu1 %v275_v2  ;;  %v855_v10 = vld [vmem:[%s1058_s30 + $0x2] sm:$0x3]  ;;  %v863_v11 = vld [vmem:[%s1058_s30 + $0xa] sm:$0x3]  ;;  %v915_v12 = vld [vmem:[%s1210_s3] ss:$0 sm:$0xff] }
  0x18   : > { %854 = vmatmul.msk.f32.vlgmr.msra.gmra.mxu0 %vm281_vm1, %v274_v3  ;;  %365 = vmatpush.msra.mxu2 %v275_v2  ;;  %v916_v15 = vld [vmem:[%s1210_s3] ss:$0 sm:$0xff]  ;;  %v857_v22 = vld [vmem:[%s1058_s30 + $0x4] sm:$0x3]  ;;  %v865_v29 = vld [vmem:[%s1058_s30 + $0xc] sm:$0x3] }
  0x19   : > { %460 = vmatpush.msrb.mxu1 %v276_v1  ;;  %428 = vmatpush.msrb.mxu0 %v276_v1  ;;  %v917_v23 = vld [vmem:[%s1210_s3] ss:$0 sm:$0xff]  ;;  %v859_v37 = vld [vmem:[%s1058_s30 + $0x6] sm:$0x3]  ;;  %v867_v41 = vld [vmem:[%s1058_s30 + $0xe] sm:$0x3] }
  0x1a   : > { %492 = vmatpush.msrb.mxu2 %v276_v1  ;;  %397 = vmatpush.msra.mxu3 %v275_v2  ;;  %v531_v9 = vld [vmem:[#allocation3] sm:$0x3]  ;;  %v918_v26 = vld [vmem:[%s1210_s3] ss:$0 sm:$0xff] }
  0x1b   : > { %461 = vmatpush.msrb.mxu1 %v275_v2  ;;  %429 = vmatpush.msrb.mxu0 %v275_v2  ;;  %v919_v34 = vld [vmem:[%s1210_s3] ss:$0 sm:$0xff] }
  0x1c   : > { %493 = vmatpush.msrb.mxu2 %v275_v2  ;;  %524 = vmatpush.msrb.mxu3 %v276_v1  ;;  %v920_v38 = vld [vmem:[%s1210_s3] ss:$0 sm:$0xff] }
  0x1d   : > { %553 = vmatpush.msra.mxu0 %v1071_v4  ;;  %856 = vmatmul.msk.f32.vlgmr.msra.gmra.mxu1 %vm281_vm1, %v855_v10  ;;  %v921_v46 = vld [vmem:[%s1210_s3] ss:$0 sm:$0xff] }
  0x1e   : > { %525 = vmatpush.msrb.mxu3 %v275_v2  ;;  %579 = vmatpush.msra.mxu1 %v1071_v4  ;;  %v922_v49 = vld [vmem:[%s1210_s3] ss:$0 sm:$0xff] }
  0x1f   : > { %554 = vmatpush.msra.mxu0 %v1077_v5  ;;  %858 = vmatmul.msk.f32.vlgmr.msra.gmra.mxu2 %vm281_vm1, %v857_v22 }
  0x20   : > { %862 = vmatmul.msk.f32.vlgmr.msrb.gmra.mxu0 %vm281_vm1, %v861_v6  ;;  %580 = vmatpush.msra.mxu1 %v1077_v5 }
  0x21   : > { %555 = vmatpush.msra.mxu0 %v1085_v7  ;;  %605 = vmatpush.msra.mxu2 %v1071_v4 }
  0x22   : > { %581 = vmatpush.msra.mxu1 %v1085_v7  ;;  %860 = vmatmul.msk.f32.vlgmr.msra.gmra.mxu3 %vm281_vm1, %v859_v37 }
  0x23   : > { %556 = vmatpush.msra.mxu0 %v1091_v8  ;;  %606 = vmatpush.msra.mxu2 %v1077_v5 }
  0x24   : > { %582 = vmatpush.msra.mxu1 %v1091_v8  ;;  %631 = vmatpush.msra.mxu3 %v1071_v4 }
  0x25   : > { %657 = vmatpush.msrb.mxu0 %v1071_v4  ;;  %864 = vmatmul.msk.f32.vlgmr.msrb.gmra.mxu1 %vm281_vm1, %v863_v11 }
  0x26   : > { %683 = vmatpush.msrb.mxu1 %v1071_v4  ;;  %607 = vmatpush.msra.mxu2 %v1085_v7 }
  0x27   : > { %658 = vmatpush.msrb.mxu0 %v1077_v5  ;;  %866 = vmatmul.msk.f32.vlgmr.msrb.gmra.mxu2 %vm281_vm1, %v865_v29 }
  0x28   : > { %869 = vmatmul.msk.f32.vlgmr.msra.gmra.mxu0 %vm537_vm2, %v531_v9  ;;  %684 = vmatpush.msrb.mxu1 %v1077_v5 }
  0x29   : > { %659 = vmatpush.msrb.mxu0 %v1085_v7  ;;  %608 = vmatpush.msra.mxu2 %v1091_v8 }
  0x2a   : > { %685 = vmatpush.msrb.mxu1 %v1085_v7  ;;  %632 = vmatpush.msra.mxu3 %v1077_v5 }
  0x2b   : > { %660 = vmatpush.msrb.mxu0 %v1091_v8  ;;  %709 = vmatpush.msrb.mxu2 %v1071_v4 }
  0x2c   : > { %686 = vmatpush.msrb.mxu1 %v1091_v8  ;;  %633 = vmatpush.msra.mxu3 %v1085_v7 }
  0x2d   : > { %710 = vmatpush.msrb.mxu2 %v1077_v5  ;;  %868 = vmatmul.msk.f32.vlgmr.msrb.gmra.mxu3 %vm281_vm1, %v867_v41 }
  0x2e   : > { %634 = vmatpush.msra.mxu3 %v1091_v8 }
  0x2f   : > { %711 = vmatpush.msrb.mxu2 %v1085_v7 }
  0x30   : > { %735 = vmatpush.msrb.mxu3 %v1071_v4 }
  0x31   : > { %712 = vmatpush.msrb.mxu2 %v1091_v8 }
  0x32   : > { %736 = vmatpush.msrb.mxu3 %v1077_v5 }
  0x34   : > { %737 = vmatpush.msrb.mxu3 %v1085_v7 }
  0x36   : > { %738 = vmatpush.msrb.mxu3 %v1091_v8 }
  0x95   : > { %v302_v13 = vpop.f32.mrf.mxu0 }
  0x96   : > { %v303_v14 = vadd.f32 %v915_v12, %v302_v13 }
  0x98   : > { %306 = vst.msk [vmem:[#allocation2] sm:$0x3] %vm305_vm3, %v303_v14 }
  0x9a   : > { %v335_v24 = vpop.f32.mrf.mxu1 }
  0x9b   : > { %v336_v25 = vadd.f32 %v917_v23, %v335_v24 }
  0x9d   : > { %v431_v16 = vpop.f32.mrf.mxu0  ;;  %338 = vst.msk [vmem:[#allocation2 + $0x2] sm:$0x3] %vm305_vm3, %v336_v25 }
  0x9e   : > { %v432_v17 = vadd.f32 %v916_v15, %v431_v16 }
  0x9f   : > { %v532_v18 = vld [vmem:[#allocation2] sm:$0x3] }
  0xa0   : > { %434 = vst.msk [vmem:[#allocation2 + $0x8] sm:$0x3] %vm305_vm3, %v432_v17 }
  0xa2   : > { %v463_v27 = vpop.f32.mrf.mxu1  ;;  %v367_v35 = vpop.f32.mrf.mxu2 }
  0xa3   : > { %v464_v28 = vadd.f32 %v918_v26, %v463_v27  ;;  %v368_v36 = vadd.f32 %v919_v34, %v367_v35 }
  0xa4   : > { %v563_v30 = vld [vmem:[#allocation2 + $0x2] sm:$0x3] }
  0xa5   : > { %v558_v19 = vpop.f32.mrf.mxu0  ;;  %466 = vst.msk [vmem:[#allocation2 + $0xa] sm:$0x3] %vm305_vm3, %v464_v28  ;;  %v399_v47 = vpop.f32.mrf.mxu3 }
  0xa6   : > { %v561_v20 = vadd.f32 %v558_v19, %v532_v18  ;;  %370 = vst.msk [vmem:[#allocation2 + $0x4] sm:$0x3] %vm305_vm3, %v368_v36  ;;  %v400_v48 = vadd.f32 %v921_v46, %v399_v47 }
  0xa7   : > { %v641_v56 = vld [vmem:[#allocation2 + $0x8] sm:$0x3] }
  0xa8   : > { %923 = vtanh.f32 %v561_v20  ;;  %402 = vst.msk [vmem:[#allocation2 + $0x6] sm:$0x3] %vm305_vm3, %v400_v48 }
  0xaa   : > { %v495_v39 = vpop.f32.mrf.mxu2 }
  0xab   : > { %v496_v40 = vadd.f32 %v920_v38, %v495_v39 }
  0xac   : > { %v667_v60 = vld [vmem:[#allocation2 + $0xa] sm:$0x3] }
  0xad   : > { %498 = vst.msk [vmem:[#allocation2 + $0xc] sm:$0x3] %vm305_vm3, %v496_v40  ;;  %v589_v42 = vld [vmem:[#allocation2 + $0x4] sm:$0x3] }
  0xae   : > { %v924_v21 = vpop.eup %923 }
  0xaf   : > { %870 = vmatmul.msk.f32.vlgmr.msra.gmra.mxu1 %vm537_vm2, %v924_v21  ;;  %v615_v52 = vld [vmem:[#allocation2 + $0x6] sm:$0x3] }
  0xb0   : > { %v527_v50 = vpop.f32.mrf.mxu3 }
  0xb1   : > { %v528_v51 = vadd.f32 %v922_v49, %v527_v50 }
  0xb3   : > { %530 = vst.msk [vmem:[#allocation2 + $0xe] sm:$0x3] %vm305_vm3, %v528_v51 }
  0xb4   : > { %v693_v0 = vld [vmem:[#allocation2 + $0xc] sm:$0x3] }
  0xba   : > { %v719_v4 = vld [vmem:[#allocation2 + $0xe] sm:$0x3] }
 0x12c   : > { %v584_v31 = vpop.f32.mrf.mxu1 }
 0x12d   : > { %v587_v32 = vadd.f32 %v584_v31, %v563_v30 }
 0x12f   : > { %925 = vtanh.f32 %v587_v32 }
 0x135   : > { %v926_v33 = vpop.eup %925 }
 0x136   : > { %871 = vmatmul.msk.f32.vlgmr.msra.gmra.mxu2 %vm537_vm2, %v926_v33 }
 0x1b9   : > { %v610_v43 = vpop.f32.mrf.mxu2 }
 0x1ba   : > { %v613_v44 = vadd.f32 %v610_v43, %v589_v42 }
 0x1bc   : > { %927 = vtanh.f32 %v613_v44 }
 0x1c2   : > { %v928_v45 = vpop.eup %927 }
 0x1c3   : > { %872 = vmatmul.msk.f32.vlgmr.msra.gmra.mxu3 %vm537_vm2, %v928_v45 }
 0x246   : > { %v636_v53 = vpop.f32.mrf.mxu3 }
 0x247   : > { %v639_v54 = vadd.f32 %v636_v53, %v615_v52 }
 0x249   : > { %929 = vtanh.f32 %v639_v54 }
 0x24f   : > { %v930_v55 = vpop.eup %929 }
 0x250   : > { %873 = vmatmul.msk.f32.vlgmr.msrb.gmra.mxu0 %vm537_vm2, %v930_v55 }
 0x2cd   : > { %v662_v57 = vpop.f32.mrf.mxu0 }
 0x2ce   : > { %v665_v58 = vadd.f32 %v662_v57, %v641_v56 }
 0x2d0   : > { %931 = vtanh.f32 %v665_v58 }
 0x2d6   : > { %v932_v59 = vpop.eup %931 }
 0x2d7   : > { %874 = vmatmul.msk.f32.vlgmr.msrb.gmra.mxu1 %vm537_vm2, %v932_v59 }
 0x354   : > { %v688_v61 = vpop.f32.mrf.mxu1 }
 0x355   : > { %v691_v62 = vadd.f32 %v688_v61, %v667_v60 }
 0x357   : > { %933 = vtanh.f32 %v691_v62 }
 0x35d   : > { %v934_v63 = vpop.eup %933 }
 0x35e   : > { %875 = vmatmul.msk.f32.vlgmr.msrb.gmra.mxu2 %vm537_vm2, %v934_v63 }
 0x3e1   : > { %v714_v1 = vpop.f32.mrf.mxu2 }
 0x3e2   : > { %v717_v2 = vadd.f32 %v714_v1, %v693_v0 }
 0x3e4   : > { %935 = vtanh.f32 %v717_v2 }
 0x3ea   : > { %v936_v3 = vpop.eup %935 }
 0x3eb   : > { %876 = vmatmul.msk.f32.vlgmr.msrb.gmra.mxu3 %vm537_vm2, %v936_v3 }
 0x46e   : > { %v740_v5 = vpop.f32.mrf.mxu3 }
 0x46f   : > { %v743_v6 = vadd.f32 %v740_v5, %v719_v4 }
 0x471   : > { %937 = vtanh.f32 %v743_v6 }
 0x474   : > { %749 = sbr.rel (%p877_p6) target bundleno = 1282 (0x502), region = 52 }
 0x477   : > { %v938_v7 = vpop.eup %937 }
 0x478   : > { %745 = vst.msk [vmem:[#allocation3] sm:$0x3] %vm305_vm3, %v938_v7 }
 0x479   : > { %v753_v8 = vld [vmem:[%s1211_s4 + $0x18] sm:$0xff]  ;;  %v752_v9 = vld [vmem:[%s1211_s4 + $0x10] sm:$0xff]  ;;  %v751_v10 = vld [vmem:[%s1211_s4 + $0x8] sm:$0xff]  ;;  %vm781_vm4 = vcmask 123904  }
 0x47a   : > { %773 = vmatpush.msra.mxu0 %v753_v8  ;;  %v750_v11 = vld [vmem:[%s1211_s4] sm:$0xff] }
 0x47b   : > { %v939_v12 = vld [vmem:[%s1212_s5] ss:$0 sm:$0xff] }
 0x47c   : > { %774 = vmatpush.msra.mxu0 %v752_v9 }
 0x47e   : > { %775 = vmatpush.msra.mxu0 %v751_v10 }
 0x480   : > { %776 = vmatpush.msra.mxu0 %v750_v11 }
 0x481   : > { %878 = vmatmul.msk.f32.vlgmr.msra.gmra.mxu0 %vm537_vm2, %v938_v7 }
 0x4fe   : > { %v778_v13 = vpop.f32.mrf.mxu0 }
 0x4ff   : > { %v779_v14 = vadd.f32 %v939_v12, %v778_v13 }
 0x501   : > { %782 = vst.msk [vmem:[#allocation4] sm:$0x3] %vm781_vm4, %v779_v14 }
 0x502 PF: > { %p887_p7 = scmp.eq.s32.totalorder %s847_s24, 1  ;;  %s793_s9 = sshll.u32 %s1213_s6, 4  ;;  %s794_s9 = int_to_ptr.hbm [resolvable:$true] %s793_s9 }
 0x503   : > { %s997_s10 = smov [#allocation4]  }
 0x504   : > { %s791_s11 = sshll.u32 %s997_s10, 4  ;;  %s792_s11 = int_to_ptr.vmem [resolvable:$true] %s791_s11 }
 0x505   : > { %884 = dma.vmem_to_hbm [thread:$0]  (%p887_p7), %s792_s11, 32, %s794_s9, [#allocation5]  }
 0x506   : > { %981 = dma.done.wait (%p887_p7), [#allocation5], 32  }
 0x507   : > { %983 = vsyncadd (%p887_p7), [#allocation5], 4294967264 }
 0x508 PF: > { %s17_s23 = sadd.s32 1, %s994_s23   ;;  %s1214_s21 = smov %s990_s22 }
 0x509   : > { %p14_p8 = scmp.ge.s32.totalorder %s17_s23, 4   ;;  %s1215_s22 = smov %s1217_s25 }
 0x50b   :  { %16 = sbr.rel (!%p14_p8) target bundleno = 2 (0x2), region = 87 }
 0x510   :  { %807 = vsyncpa [#allocation5], 1 }
 0x511   :  { %809 = vsyncpa [#allocation5 + $0x1], 1 }

</bundles_post_ra>
